<compile_context>
chip_gen: v6e
topology: v6e:2x2x1
jax: 0.10.0
libtpu: 0.0.40
codegen_flags: <defaults>
</compile_context>

<pallas_src>
import functools

import jax
import jax.numpy as jnp
import numpy as np
from jax.experimental import pallas as pl
from jax.experimental.pallas import tpu as pltpu

# ----------------------------- hyper parameters ------------------------------
GNN_NUM = 3
IN_CHANNELS = 16                 # node feature dim fed to the net is 2*IN_CHANNELS
GNN_CHANNELS = 32
SINKHORN_ITERS = 10
SINKHORN_EPS = 1e-4
VOTING_ALPHA = 200.0
# TODO(synk): voting_thresh / pixel_thresh is not used by this Voting.forward (needs pixel coords).

B = 2
N1 = 8
N2 = 8
E1 = 16
E2 = 16
F0 = 2 * IN_CHANNELS            # input node feature dim (== in_channels * 2)


# ------------------------------ parameter packing -----------------------------
def pack_params(flat_params):
    """Pack all weights / biases into a single (rows, 2C) f32 blob (one DMA).

    Per GNN layer the two Gconv linears are fused along the lane axis into one
    (fan_in, 2C) weight / (1, 2C) bias so the kernel issues ONE MXU matmul per
    layer for both branches.  The cross-graph (2C, C) linear is split into
    top / bottom halves so the kernel can use the split-weight form (no lane
    concat of activations).  Every entry is padded to a multiple of 8 rows so
    in-kernel slices stay sublane-aligned.  Returns (packed, offsets) with
    offsets[i] = (row_offset, rows, cols).
    """
    c = flat_params[0].shape[-1]
    entries = []
    for i in range(GNN_NUM):
        Wa, ba, Wu, bu, Aff = flat_params[5 * i:5 * i + 5]
        entries.append(jnp.concatenate([Wa, Wu], axis=1))    # (fan_in, 2C)
        entries.append(jnp.concatenate([ba, bu], axis=1))    # (1, 2C)
        entries.append(Aff)                                   # (C, C)
    Wc = flat_params[5 * GNN_NUM]
    bc = flat_params[5 * GNN_NUM + 1]
    entries += [Wc[:c, :], Wc[c:, :], bc]

    width = max(int(e.shape[1]) for e in entries)
    chunks, offsets, off = [], [], 0
    for p in entries:
        p = jnp.asarray(p, jnp.float32)
        r, cc = p.shape
        r_pad = ((r + 7) // 8) * 8
        p = jnp.pad(p, ((0, r_pad - r), (0, width - cc)))
        chunks.append(p)
        offsets.append((off, r, cc))
        off += r_pad
    return jnp.concatenate(chunks, axis=0), tuple(offsets)


# ---------------------------------- kernel -----------------------------------
def pcagm_kernel(row_m_ref, col_m_ref,
                 node_src_ref, node_tgt_ref,
                 G_src_ref, H_src_ref, G_tgt_ref, H_tgt_ref,
                 params_ref, s_ref, *, offsets):
    f32 = jnp.float32
    C = GNN_CHANNELS

    def pget(idx):
        off, rows, cols = offsets[idx]
        return params_ref[off:off + rows, :cols]

    x_src = node_src_ref[...]                  # (bb, n1, F)
    x_tgt = node_tgt_ref[...]                  # (bb, n2, F)
    bb, n1, _ = x_src.shape
    n2 = x_tgt.shape[1]
    m1, m2 = bb * n1, bb * n2

    mm = lambda a, w: jnp.dot(a, w, preferred_element_type=f32)                         # 2-D
    bmm = lambda a, x: jnp.einsum('bij,bjc->bic', a, x, preferred_element_type=f32)      # batched A@B
    bmm_nt = lambda a, x: jnp.einsum('bic,bjc->bij', a, x, preferred_element_type=f32)   # batched A@B^T
    bmm_tn = lambda a, x: jnp.einsum('bij,bic->bjc', a, x, preferred_element_type=f32)   # batched A^T@B

    def stack_rows(a, b_):
        # stack all graphs (src + tgt, all batch elems) along the M/sublane axis
        return jnp.concatenate([a.reshape(m1, a.shape[-1]),
                                b_.reshape(m2, b_.shape[-1])], axis=0)

    def unstack_rows(a):
        c = a.shape[-1]
        return a[:m1].reshape(bb, n1, c), a[m1:].reshape(bb, n2, c)

    # adjacency from edge incidence:  A = G @ H^T,  then F.normalize(A, p=1, dim=-2)
    A_src = bmm_nt(G_src_ref[...], H_src_ref[...])       # (bb, n1, n1)
    A_tgt = bmm_nt(G_tgt_ref[...], H_tgt_ref[...])       # (bb, n2, n2)

    def l1_colnorm(A):
        d = jnp.maximum(jnp.sum(jnp.abs(A), axis=1, keepdims=True), f32(1e-12))
        return A * pl.reciprocal(d, approx=True)

    An_src = l1_colnorm(A_src)
    An_tgt = l1_colnorm(A_tgt)

    # validity masks (precomputed f32 inputs; no in-kernel iota / compare / select)
    row_m = row_m_ref[...]                                # (bb, n1, 1)
    col_m = col_m_ref[...]                                # (bb, 1, n2)
    valid = row_m * col_m                                 # (bb, n1, n2)
    col_ok = col_m > f32(0.5)                             # bool, for the voting mask
    col_guard = f32(1.0) - col_m                          # keeps invalid-col denoms > 0
    row_guard = f32(1.0) - row_m                          # keeps invalid-row denoms > 0

    x_all = stack_rows(x_src, x_tgt)                      # (m1+m2, F)
    s = None
    for i in range(GNN_NUM):
        W_au, b_au, Aff = pget(3 * i), pget(3 * i + 1), pget(3 * i + 2)

        # ---- Siamese Gconv: ONE fused (fan_in, 2C) matmul over both graphs & whole batch ----
        y = jnp.maximum(mm(x_all, W_au) + b_au, f32(0.0))  # (m, 2C) = [relu(xWa+ba) | relu(xWu+bu)]
        ax_s, ax_t = unstack_rows(y[:, :C])
        ux_s, ux_t = unstack_rows(y[:, C:])
        x_src = bmm(An_src, ax_s) + ux_s                   # (bb, n1, C)
        x_tgt = bmm(An_tgt, ax_t) + ux_t                   # (bb, n2, C)
        x_all = stack_rows(x_src, x_tgt)

        if i < GNN_NUM - 2:
            # s of early layers is never consumed (cross-graph uses i==GNN_NUM-2,
            # output uses the last layer): skip affinity / voting / Sinkhorn.
            continue

        # ---- Affinity:  M = X Aff Y^T ----
        xa = mm(x_src.reshape(m1, C), Aff).reshape(bb, n1, C)
        sim = bmm_nt(xa, x_tgt)                            # (bb, n1, n2)

        # ---- Voting: masked softmax over valid columns ----
        logits = jnp.where(col_ok, f32(VOTING_ALPHA) * sim, f32(-1e30))
        logits = logits - jnp.max(logits, axis=-1, keepdims=True)
        e = jnp.exp(logits)
        sm = e * pl.reciprocal(jnp.sum(e, axis=-1, keepdims=True), approx=True)

        # ---- Sinkhorn: mask once, then plain alternating normalization ----
        s = (sm + f32(SINKHORN_EPS)) * valid               # zero outside valid block
        for it in range(SINKHORN_ITERS):
            if it % 2 == 0:
                denom = jnp.sum(s, axis=1, keepdims=True) + col_guard  # (bb,1,n2)
            else:
                denom = jnp.sum(s, axis=2, keepdims=True) + row_guard  # (bb,n1,1)
            s = s * (f32(1.0) / denom)   # exact reciprocal on tiny denom (numeric fidelity)

        # ---- cross-graph feature exchange (split-weight form, no lane concat) ----
        if i == GNN_NUM - 2:
            Wc1, Wc2, bc = pget(3 * GNN_NUM), pget(3 * GNN_NUM + 1), pget(3 * GNN_NUM + 2)
            cross_s = bmm(s, x_tgt)                        # (bb, n1, C)   s   @ x_tgt
            cross_t = bmm_tn(s, x_src)                     # (bb, n2, C)   s^T @ x_src  (one batched op)
            cross_all = stack_rows(cross_s, cross_t)
            x_all = mm(x_all, Wc1) + mm(cross_all, Wc2) + bc
            x_src, x_tgt = unstack_rows(x_all)

    s_ref[...] = s.astype(s_ref.dtype)


# ----------------------------------- wrapper ----------------------------------
def pcagm_forward(flat_params, node_src, node_tgt, G_src, G_tgt, H_src, H_tgt,
                  ns_src, ns_tgt, *, b_blk=None):
    batch, n1, f0 = node_src.shape
    n2 = node_tgt.shape[1]
    if b_blk is None:
        # grid at least 2 wide by default so the "parallel" batch axis can be
        # sharded across v7x's two TensorCores; neutral on v5e/v6e (single TC).
        b_blk = batch // 2 if (batch >= 2 and batch % 2 == 0) else batch
    b_blk = max(1, b_blk)
    assert batch % b_blk == 0, "b_blk must divide the batch"

    packed, offsets = pack_params(flat_params)     # one parameter blob -> one DMA

    # validity masks built once on the host side (f32, multiplicative)
    ns_src = jnp.asarray(ns_src, jnp.int32)
    ns_tgt = jnp.asarray(ns_tgt, jnp.int32)
    row_mask = (jnp.arange(n1, dtype=jnp.int32)[None, :, None]
                < ns_src[:, None, None]).astype(jnp.float32)        # (B, n1, 1)
    col_mask = (jnp.arange(n2, dtype=jnp.int32)[None, None, :]
                < ns_tgt[:, None, None]).astype(jnp.float32)        # (B, 1, n2)

    bmap3 = lambda b: (b, 0, 0)
    in_specs = [
        pl.BlockSpec((b_blk, n1, 1), bmap3),                    # row validity mask
        pl.BlockSpec((b_blk, 1, n2), bmap3),                    # col validity mask
        pl.BlockSpec((b_blk, n1, f0), bmap3),                   # node_src
        pl.BlockSpec((b_blk, n2, f0), bmap3),                   # node_tgt
        pl.BlockSpec((b_blk, n1, G_src.shape[2]), bmap3),       # G_src
        pl.BlockSpec((b_blk, n1, H_src.shape[2]), bmap3),       # H_src
        pl.BlockSpec((b_blk, n2, G_tgt.shape[2]), bmap3),       # G_tgt
        pl.BlockSpec((b_blk, n2, H_tgt.shape[2]), bmap3),       # H_tgt
        pl.BlockSpec(packed.shape, lambda b: (0, 0)),           # packed params (constant block)
    ]
    # TODO(synk): for large b_blk, fold the batch into the lane axis of the output
    # (lane-dense store >=128 wide); negligible at this size (n2=8, B=2).
    out_spec = pl.BlockSpec((b_blk, n1, n2), bmap3)

    kernel = functools.partial(pcagm_kernel, offsets=offsets)
    return pl.pallas_call(
        kernel,
        out_shape=jax.ShapeDtypeStruct((batch, n1, n2), jnp.float32),
        grid_spec=pltpu.PrefetchScalarGridSpec(
            num_scalar_prefetch=0,
            grid=(batch // b_blk,),
            in_specs=in_specs,
            out_specs=out_spec),
        compiler_params=pltpu.CompilerParams(
            # batch blocks are independent; lets v7x shard them across its 2 TCs
            dimension_semantics=("parallel",)),
    )(row_mask, col_mask, node_src, node_tgt, G_src, H_src, G_tgt, H_tgt, packed)


# ------------------------------ pure-JAX reference ---------------------------
def pcagm_reference(flat_params, node_src, node_tgt, G_src, G_tgt, H_src, H_tgt,
                    ns_src, ns_tgt):
    """Straightforward per-graph reference (exact divides, HIGHEST precision)."""
    hp = jax.lax.Precision.HIGHEST
    mm = lambda a, b: jnp.dot(a, b, precision=hp, preferred_element_type=jnp.float32)
    layer_params = [tuple(flat_params[5 * i:5 * i + 5]) for i in range(GNN_NUM)]
    Wc = flat_params[5 * GNN_NUM]
    bc = flat_params[5 * GNN_NUM + 1]

    outs = []
    for b in range(node_src.shape[0]):
        ns, nt = ns_src[b], ns_tgt[b]
        x_s, x_t = node_src[b], node_tgt[b]
        A_s = mm(G_src[b], H_src[b].T)
        A_t = mm(G_tgt[b], H_tgt[b].T)

        def l1(A):
            d = jnp.maximum(jnp.sum(jnp.abs(A), axis=0, keepdims=True), 1e-12)
            return A / d

        An_s, An_t = l1(A_s), l1(A_t)
        n1, n2 = x_s.shape[0], x_t.shape[0]
        rid = jax.lax.broadcasted_iota(jnp.int32, (n1, n2), 0)
        cid = jax.lax.broadcasted_iota(jnp.int32, (n1, n2), 1)
        rv, cv = rid < ns, cid < nt
        vv = jnp.logical_and(rv, cv)

        s = None
        for i in range(GNN_NUM):
            Wa, ba, Wu, bu, Aff = layer_params[i]

            def gconv(An, x):
                ax = jnp.maximum(mm(x, Wa) + ba, 0.0)
                ux = jnp.maximum(mm(x, Wu) + bu, 0.0)
                return mm(An, ax) + ux

            x_s = gconv(An_s, x_s)
            x_t = gconv(An_t, x_t)
            M = mm(mm(x_s, Aff), x_t.T)
            logits = jnp.where(cv, VOTING_ALPHA * M, jnp.float32(-1e30))
            logits = logits - jnp.max(logits, axis=-1, keepdims=True)
            e = jnp.exp(logits)
            sm = e / jnp.sum(e, axis=-1, keepdims=True)
            s = jnp.where(vv, sm, 0.0)

            s = s + jnp.float32(SINKHORN_EPS)
            for it in range(SINKHORN_ITERS):
                if it % 2 == 0:
                    denom = jnp.sum(jnp.where(rv, s, 0.0), axis=0, keepdims=True)
                else:
                    denom = jnp.sum(jnp.where(cv, s, 0.0), axis=1, keepdims=True)
                s = s * jnp.where(vv, 1.0 / denom, 0.0)

            if i == GNN_NUM - 2:
                x_s_new = mm(jnp.concatenate([x_s, mm(s, x_t)], axis=-1), Wc) + bc
                x_t_new = mm(jnp.concatenate([x_t, mm(s.T, x_s)], axis=-1), Wc) + bc
                x_s, x_t = x_s_new, x_t_new
        outs.append(s)
    return jnp.stack(outs, axis=0)


# ------------------------------- parameter init -------------------------------
def init_params(key):
    flat = []
    c = GNN_CHANNELS

    def linear(key, fan_in, fan_out):
        k1, k2 = jax.random.split(key)
        bound = 1.0 / np.sqrt(fan_in)
        W = jax.random.uniform(k1, (fan_in, fan_out), jnp.float32, -bound, bound)
        b = jax.random.uniform(k2, (1, fan_out), jnp.float32, -bound, bound)
        return W, b

    for i in range(GNN_NUM):
        fan_in = F0 if i == 0 else c
        key, ka, ku, kaff = jax.random.split(key, 4)
        Wa, ba = linear(ka, fan_in, c)
        Wu, bu = linear(ku, fan_in, c)
        stdv = 1.0 / np.sqrt(c)
        Aff = jax.random.uniform(kaff, (c, c), jnp.float32, -stdv, stdv) + jnp.eye(c, dtype=jnp.float32)
        flat += [Wa, ba, Wu, bu, Aff]

    key, kc = jax.random.split(key)
    Wc, bc = linear(kc, 2 * c, c)
    flat += [Wc, bc]
    return flat


# ------------------------------------ main ------------------------------------
if __name__ == "__main__":
    key = jax.random.PRNGKey(0)
    key, k_par, k1, k2, k3, k4, k5, k6 = jax.random.split(key, 8)

    flat_params = init_params(k_par)

    node_src = jax.random.normal(k1, (B, N1, F0), jnp.float32) * 0.5
    node_tgt = jax.random.normal(k2, (B, N2, F0), jnp.float32) * 0.5
    # binary edge incidence matrices (non-negative, like real G/H)
    G_src = (jax.random.uniform(k3, (B, N1, E1)) < 0.35).astype(jnp.float32)
    H_src = (jax.random.uniform(k4, (B, N1, E1)) < 0.35).astype(jnp.float32)
    G_tgt = (jax.random.uniform(k5, (B, N2, E2)) < 0.35).astype(jnp.float32)
    H_tgt = (jax.random.uniform(k6, (B, N2, E2)) < 0.35).astype(jnp.float32)
    ns_src = jnp.array([N1, 6], dtype=jnp.int32)
    ns_tgt = jnp.array([N2, 5], dtype=jnp.int32)

    s_kernel = pcagm_forward(flat_params, node_src, node_tgt, G_src, G_tgt,
                             H_src, H_tgt, ns_src, ns_tgt)
    s_kernel = jax.block_until_ready(s_kernel)

    s_ref = jax.block_until_ready(
        pcagm_reference(flat_params, node_src, node_tgt, G_src, G_tgt,
                        H_src, H_tgt, ns_src, ns_tgt))

    np.testing.assert_allclose(np.asarray(s_kernel), np.asarray(s_ref),
                               rtol=2e-2, atol=3e-3)
    assert np.isfinite(np.asarray(s_kernel)).all()
    print("KERNEL_OK")
</pallas_src>

<mosaic_0001>
module attributes {stable_mosaic.version = 11 : i64} {
  func.func @pcagm_kernel(%arg0: i32, %arg1: memref<1x8x1xf32, #tpu.memory_space<vmem>>, %arg2: memref<1x1x8xf32, #tpu.memory_space<vmem>>, %arg3: memref<1x8x32xf32, #tpu.memory_space<vmem>>, %arg4: memref<1x8x32xf32, #tpu.memory_space<vmem>>, %arg5: memref<1x8x16xf32, #tpu.memory_space<vmem>>, %arg6: memref<1x8x16xf32, #tpu.memory_space<vmem>>, %arg7: memref<1x8x16xf32, #tpu.memory_space<vmem>>, %arg8: memref<1x8x16xf32, #tpu.memory_space<vmem>>, %arg9: memref<288x64xf32, #tpu.memory_space<vmem>>, %arg10: memref<1x8x8xf32, #tpu.memory_space<vmem>>) attributes {dimension_semantics = [#tpu.dimension_semantics<parallel>], iteration_bounds = array<i64: 2>, scalar_prefetch = 0 : i64, scratch_operands = 0 : i64, tpu.core_type = #tpu.core_type<tc>, window_params = [{transform_indices = @transform_0, window_bounds = array<i64: 1, 8, 1>}, {transform_indices = @transform_1, window_bounds = array<i64: 1, 1, 8>}, {transform_indices = @transform_2, window_bounds = array<i64: 1, 8, 32>}, {transform_indices = @transform_3, window_bounds = array<i64: 1, 8, 32>}, {transform_indices = @transform_4, window_bounds = array<i64: 1, 8, 16>}, {transform_indices = @transform_5, window_bounds = array<i64: 1, 8, 16>}, {transform_indices = @transform_6, window_bounds = array<i64: 1, 8, 16>}, {transform_indices = @transform_7, window_bounds = array<i64: 1, 8, 16>}, {pipeline_mode = #tpu.pipeline_mode<synchronous>, transform_indices = @transform_8, window_bounds = array<i64: 288, 64>}, {transform_indices = @transform_9, window_bounds = array<i64: 1, 8, 8>}]} {
    %c0 = arith.constant 0 : index
    %c0_0 = arith.constant 0 : index
    %c0_1 = arith.constant 0 : index
    %0 = vector.load %arg3[%c0, %c0_0, %c0_1] : memref<1x8x32xf32, #tpu.memory_space<vmem>>, vector<1x8x32xf32>
    %c0_2 = arith.constant 0 : index
    %c0_3 = arith.constant 0 : index
    %c0_4 = arith.constant 0 : index
    %1 = vector.load %arg4[%c0_2, %c0_3, %c0_4] : memref<1x8x32xf32, #tpu.memory_space<vmem>>, vector<1x8x32xf32>
    %c0_5 = arith.constant 0 : index
    %c0_6 = arith.constant 0 : index
    %c0_7 = arith.constant 0 : index
    %2 = vector.load %arg5[%c0_5, %c0_6, %c0_7] : memref<1x8x16xf32, #tpu.memory_space<vmem>>, vector<1x8x16xf32>
    %c0_8 = arith.constant 0 : index
    %c0_9 = arith.constant 0 : index
    %c0_10 = arith.constant 0 : index
    %3 = vector.load %arg6[%c0_8, %c0_9, %c0_10] : memref<1x8x16xf32, #tpu.memory_space<vmem>>, vector<1x8x16xf32>
    "tpu.trace_start"() <{level = 10 : i32, message = "bic,bjc->bij"}> : () -> ()
    %cst = arith.constant dense<0.000000e+00> : vector<1x8x8xf32>
    %4 = tpu.matmul %2, %3, %cst {dimension_numbers = #tpu.dot_dimension_numbers<[2], [2], [1], [1], [0, 0, 0, 1, 1, 1], [0], [0]>} : vector<1x8x16xf32>, vector<1x8x16xf32>, vector<1x8x8xf32> -> vector<1x8x8xf32>
    "tpu.trace_stop"() : () -> ()
    %c0_11 = arith.constant 0 : index
    %c0_12 = arith.constant 0 : index
    %c0_13 = arith.constant 0 : index
    %5 = vector.load %arg7[%c0_11, %c0_12, %c0_13] : memref<1x8x16xf32, #tpu.memory_space<vmem>>, vector<1x8x16xf32>
    %c0_14 = arith.constant 0 : index
    %c0_15 = arith.constant 0 : index
    %c0_16 = arith.constant 0 : index
    %6 = vector.load %arg8[%c0_14, %c0_15, %c0_16] : memref<1x8x16xf32, #tpu.memory_space<vmem>>, vector<1x8x16xf32>
    "tpu.trace_start"() <{level = 10 : i32, message = "bic,bjc->bij"}> : () -> ()
    %cst_17 = arith.constant dense<0.000000e+00> : vector<1x8x8xf32>
    %7 = tpu.matmul %5, %6, %cst_17 {dimension_numbers = #tpu.dot_dimension_numbers<[2], [2], [1], [1], [0, 0, 0, 1, 1, 1], [0], [0]>} : vector<1x8x16xf32>, vector<1x8x16xf32>, vector<1x8x8xf32> -> vector<1x8x8xf32>
    "tpu.trace_stop"() : () -> ()
    %8 = math.absf %4 : vector<1x8x8xf32>
    %cst_18 = arith.constant dense<0.000000e+00> : vector<1x8xf32>
    %9 = vector.multi_reduction <add>, %8, %cst_18 [1] : vector<1x8x8xf32> to vector<1x8xf32>
    %10 = vector.shape_cast %9 : vector<1x8xf32> to vector<1x1x8xf32>
    %cst_19 = arith.constant 9.99999996E-13 : f32
    %11 = vector.broadcast %cst_19 : f32 to vector<1x1x8xf32>
    %12 = arith.maximumf %10, %11 : vector<1x1x8xf32>
    %13 = tpu.reciprocal %12 {approx = true} : vector<1x1x8xf32> -> vector<1x1x8xf32>
    %14 = vector.broadcast %13 : vector<1x1x8xf32> to vector<1x8x8xf32>
    %15 = arith.mulf %4, %14 : vector<1x8x8xf32>
    %16 = math.absf %7 : vector<1x8x8xf32>
    %cst_20 = arith.constant dense<0.000000e+00> : vector<1x8xf32>
    %17 = vector.multi_reduction <add>, %16, %cst_20 [1] : vector<1x8x8xf32> to vector<1x8xf32>
    %18 = vector.shape_cast %17 : vector<1x8xf32> to vector<1x1x8xf32>
    %cst_21 = arith.constant 9.99999996E-13 : f32
    %19 = vector.broadcast %cst_21 : f32 to vector<1x1x8xf32>
    %20 = arith.maximumf %18, %19 : vector<1x1x8xf32>
    %21 = tpu.reciprocal %20 {approx = true} : vector<1x1x8xf32> -> vector<1x1x8xf32>
    %22 = vector.broadcast %21 : vector<1x1x8xf32> to vector<1x8x8xf32>
    %23 = arith.mulf %7, %22 : vector<1x8x8xf32>
    %c0_22 = arith.constant 0 : index
    %c0_23 = arith.constant 0 : index
    %c0_24 = arith.constant 0 : index
    %24 = vector.load %arg1[%c0_22, %c0_23, %c0_24] : memref<1x8x1xf32, #tpu.memory_space<vmem>>, vector<1x8x1xf32>
    %c0_25 = arith.constant 0 : index
    %c0_26 = arith.constant 0 : index
    %c0_27 = arith.constant 0 : index
    %25 = vector.load %arg2[%c0_25, %c0_26, %c0_27] : memref<1x1x8xf32, #tpu.memory_space<vmem>>, vector<1x1x8xf32>
    %26 = vector.broadcast %24 : vector<1x8x1xf32> to vector<1x8x8xf32>
    %27 = vector.broadcast %25 : vector<1x1x8xf32> to vector<1x8x8xf32>
    %28 = arith.mulf %26, %27 : vector<1x8x8xf32>
    %cst_28 = arith.constant 5.000000e-01 : f32
    %29 = vector.broadcast %cst_28 : f32 to vector<1x1x8xf32>
    %30 = arith.cmpf ogt, %25, %29 : vector<1x1x8xf32>
    %cst_29 = arith.constant 1.000000e+00 : f32
    %31 = vector.broadcast %cst_29 : f32 to vector<1x1x8xf32>
    %32 = arith.subf %31, %25 : vector<1x1x8xf32>
    %cst_30 = arith.constant 1.000000e+00 : f32
    %33 = vector.broadcast %cst_30 : f32 to vector<1x8x1xf32>
    %34 = arith.subf %33, %24 : vector<1x8x1xf32>
    %35 = vector.shape_cast %0 : vector<1x8x32xf32> to vector<8x32xf32>
    %36 = vector.shape_cast %1 : vector<1x8x32xf32> to vector<8x32xf32>
    %37 = tpu.concatenate %35, %36 in 0 : vector<8x32xf32>, vector<8x32xf32> -> vector<16x32xf32>
    %c0_31 = arith.constant 0 : index
    %c0_32 = arith.constant 0 : index
    %38 = vector.load %arg9[%c0_31, %c0_32] : memref<288x64xf32, #tpu.memory_space<vmem>>, vector<32x64xf32>
    %c32 = arith.constant 32 : index
    %c0_33 = arith.constant 0 : index
    %39 = vector.load %arg9[%c32, %c0_33] : memref<288x64xf32, #tpu.memory_space<vmem>>, vector<1x64xf32>
    %cst_34 = arith.constant dense<0.000000e+00> : vector<16x64xf32>
    %40 = tpu.matmul %37, %38, %cst_34 {dimension_numbers = #tpu.dot_dimension_numbers<[1], [0], [0], [1], [0, 0, 1, 1], [], []>} : vector<16x32xf32>, vector<32x64xf32>, vector<16x64xf32> -> vector<16x64xf32>
    %41 = vector.broadcast %39 : vector<1x64xf32> to vector<16x64xf32>
    %42 = arith.addf %40, %41 : vector<16x64xf32>
    %cst_35 = arith.constant 0.000000e+00 : f32
    %43 = vector.broadcast %cst_35 : f32 to vector<16x64xf32>
    %44 = arith.maximumf %42, %43 : vector<16x64xf32>
    %45 = vector.extract_strided_slice %44 {offsets = [0, 0], sizes = [16, 32], strides = [1, 1]} : vector<16x64xf32> to vector<16x32xf32>
    %46 = vector.extract_strided_slice %45 {offsets = [0, 0], sizes = [8, 32], strides = [1, 1]} : vector<16x32xf32> to vector<8x32xf32>
    %47 = vector.shape_cast %46 : vector<8x32xf32> to vector<1x8x32xf32>
    %48 = vector.extract_strided_slice %45 {offsets = [8, 0], sizes = [8, 32], strides = [1, 1]} : vector<16x32xf32> to vector<8x32xf32>
    %49 = vector.shape_cast %48 : vector<8x32xf32> to vector<1x8x32xf32>
    %50 = vector.extract_strided_slice %44 {offsets = [0, 32], sizes = [16, 32], strides = [1, 1]} : vector<16x64xf32> to vector<16x32xf32>
    %51 = vector.extract_strided_slice %50 {offsets = [0, 0], sizes = [8, 32], strides = [1, 1]} : vector<16x32xf32> to vector<8x32xf32>
    %52 = vector.shape_cast %51 : vector<8x32xf32> to vector<1x8x32xf32>
    %53 = vector.extract_strided_slice %50 {offsets = [8, 0], sizes = [8, 32], strides = [1, 1]} : vector<16x32xf32> to vector<8x32xf32>
    %54 = vector.shape_cast %53 : vector<8x32xf32> to vector<1x8x32xf32>
    "tpu.trace_start"() <{level = 10 : i32, message = "bij,bjc->bic"}> : () -> ()
    %cst_36 = arith.constant dense<0.000000e+00> : vector<1x8x32xf32>
    %55 = tpu.matmul %15, %47, %cst_36 {dimension_numbers = #tpu.dot_dimension_numbers<[2], [1], [1], [2], [0, 0, 0, 1, 1, 2], [0], [0]>} : vector<1x8x8xf32>, vector<1x8x32xf32>, vector<1x8x32xf32> -> vector<1x8x32xf32>
    "tpu.trace_stop"() : () -> ()
    %56 = arith.addf %55, %52 : vector<1x8x32xf32>
    "tpu.trace_start"() <{level = 10 : i32, message = "bij,bjc->bic"}> : () -> ()
    %cst_37 = arith.constant dense<0.000000e+00> : vector<1x8x32xf32>
    %57 = tpu.matmul %23, %49, %cst_37 {dimension_numbers = #tpu.dot_dimension_numbers<[2], [1], [1], [2], [0, 0, 0, 1, 1, 2], [0], [0]>} : vector<1x8x8xf32>, vector<1x8x32xf32>, vector<1x8x32xf32> -> vector<1x8x32xf32>
    "tpu.trace_stop"() : () -> ()
    %58 = arith.addf %57, %54 : vector<1x8x32xf32>
    %59 = vector.shape_cast %56 : vector<1x8x32xf32> to vector<8x32xf32>
    %60 = vector.shape_cast %58 : vector<1x8x32xf32> to vector<8x32xf32>
    %61 = tpu.concatenate %59, %60 in 0 : vector<8x32xf32>, vector<8x32xf32> -> vector<16x32xf32>
    %c72 = arith.constant 72 : index
    %c0_38 = arith.constant 0 : index
    %62 = vector.load %arg9[%c72, %c0_38] : memref<288x64xf32, #tpu.memory_space<vmem>>, vector<32x64xf32>
    %c104 = arith.constant 104 : index
    %c0_39 = arith.constant 0 : index
    %63 = vector.load %arg9[%c104, %c0_39] : memref<288x64xf32, #tpu.memory_space<vmem>>, vector<1x64xf32>
    %c112 = arith.constant 112 : index
    %c0_40 = arith.constant 0 : index
    %64 = vector.load %arg9[%c112, %c0_40] : memref<288x64xf32, #tpu.memory_space<vmem>>, vector<32x32xf32>
    %cst_41 = arith.constant dense<0.000000e+00> : vector<16x64xf32>
    %65 = tpu.matmul %61, %62, %cst_41 {dimension_numbers = #tpu.dot_dimension_numbers<[1], [0], [0], [1], [0, 0, 1, 1], [], []>} : vector<16x32xf32>, vector<32x64xf32>, vector<16x64xf32> -> vector<16x64xf32>
    %66 = vector.broadcast %63 : vector<1x64xf32> to vector<16x64xf32>
    %67 = arith.addf %65, %66 : vector<16x64xf32>
    %cst_42 = arith.constant 0.000000e+00 : f32
    %68 = vector.broadcast %cst_42 : f32 to vector<16x64xf32>
    %69 = arith.maximumf %67, %68 : vector<16x64xf32>
    %70 = vector.extract_strided_slice %69 {offsets = [0, 0], sizes = [16, 32], strides = [1, 1]} : vector<16x64xf32> to vector<16x32xf32>
    %71 = vector.extract_strided_slice %70 {offsets = [0, 0], sizes = [8, 32], strides = [1, 1]} : vector<16x32xf32> to vector<8x32xf32>
    %72 = vector.shape_cast %71 : vector<8x32xf32> to vector<1x8x32xf32>
    %73 = vector.extract_strided_slice %70 {offsets = [8, 0], sizes = [8, 32], strides = [1, 1]} : vector<16x32xf32> to vector<8x32xf32>
    %74 = vector.shape_cast %73 : vector<8x32xf32> to vector<1x8x32xf32>
    %75 = vector.extract_strided_slice %69 {offsets = [0, 32], sizes = [16, 32], strides = [1, 1]} : vector<16x64xf32> to vector<16x32xf32>
    %76 = vector.extract_strided_slice %75 {offsets = [0, 0], sizes = [8, 32], strides = [1, 1]} : vector<16x32xf32> to vector<8x32xf32>
    %77 = vector.shape_cast %76 : vector<8x32xf32> to vector<1x8x32xf32>
    %78 = vector.extract_strided_slice %75 {offsets = [8, 0], sizes = [8, 32], strides = [1, 1]} : vector<16x32xf32> to vector<8x32xf32>
    %79 = vector.shape_cast %78 : vector<8x32xf32> to vector<1x8x32xf32>
    "tpu.trace_start"() <{level = 10 : i32, message = "bij,bjc->bic"}> : () -> ()
    %cst_43 = arith.constant dense<0.000000e+00> : vector<1x8x32xf32>
    %80 = tpu.matmul %15, %72, %cst_43 {dimension_numbers = #tpu.dot_dimension_numbers<[2], [1], [1], [2], [0, 0, 0, 1, 1, 2], [0], [0]>} : vector<1x8x8xf32>, vector<1x8x32xf32>, vector<1x8x32xf32> -> vector<1x8x32xf32>
    "tpu.trace_stop"() : () -> ()
    %81 = arith.addf %80, %77 : vector<1x8x32xf32>
    "tpu.trace_start"() <{level = 10 : i32, message = "bij,bjc->bic"}> : () -> ()
    %cst_44 = arith.constant dense<0.000000e+00> : vector<1x8x32xf32>
    %82 = tpu.matmul %23, %74, %cst_44 {dimension_numbers = #tpu.dot_dimension_numbers<[2], [1], [1], [2], [0, 0, 0, 1, 1, 2], [0], [0]>} : vector<1x8x8xf32>, vector<1x8x32xf32>, vector<1x8x32xf32> -> vector<1x8x32xf32>
    "tpu.trace_stop"() : () -> ()
    %83 = arith.addf %82, %79 : vector<1x8x32xf32>
    %84 = vector.shape_cast %81 : vector<1x8x32xf32> to vector<8x32xf32>
    %85 = vector.shape_cast %83 : vector<1x8x32xf32> to vector<8x32xf32>
    %86 = tpu.concatenate %84, %85 in 0 : vector<8x32xf32>, vector<8x32xf32> -> vector<16x32xf32>
    %87 = vector.shape_cast %81 : vector<1x8x32xf32> to vector<8x32xf32>
    %cst_45 = arith.constant dense<0.000000e+00> : vector<8x32xf32>
    %88 = tpu.matmul %87, %64, %cst_45 {dimension_numbers = #tpu.dot_dimension_numbers<[1], [0], [0], [1], [0, 0, 1, 1], [], []>} : vector<8x32xf32>, vector<32x32xf32>, vector<8x32xf32> -> vector<8x32xf32>
    %89 = vector.shape_cast %88 : vector<8x32xf32> to vector<1x8x32xf32>
    "tpu.trace_start"() <{level = 10 : i32, message = "bic,bjc->bij"}> : () -> ()
    %cst_46 = arith.constant dense<0.000000e+00> : vector<1x8x8xf32>
    %90 = tpu.matmul %89, %83, %cst_46 {dimension_numbers = #tpu.dot_dimension_numbers<[2], [2], [1], [1], [0, 0, 0, 1, 1, 1], [0], [0]>} : vector<1x8x32xf32>, vector<1x8x32xf32>, vector<1x8x8xf32> -> vector<1x8x8xf32>
    "tpu.trace_stop"() : () -> ()
    %cst_47 = arith.constant 2.000000e+02 : f32
    %91 = vector.broadcast %cst_47 : f32 to vector<1x8x8xf32>
    %92 = arith.mulf %91, %90 : vector<1x8x8xf32>
    %cst_48 = arith.constant -1.000000e+30 : f32
    %93 = vector.shape_cast %30 : vector<1x1x8xi1> to vector<1x1x8xi1>
    %94 = vector.broadcast %93 : vector<1x1x8xi1> to vector<1x8x8xi1>
    %95 = vector.broadcast %cst_48 : f32 to vector<1x8x8xf32>
    %96 = arith.select %94, %92, %95 : vector<1x8x8xi1>, vector<1x8x8xf32>
    %cst_49 = arith.constant dense<0xFF800000> : vector<1x8xf32>
    %97 = vector.multi_reduction <maximumf>, %96, %cst_49 [2] : vector<1x8x8xf32> to vector<1x8xf32>
    %98 = vector.shape_cast %97 : vector<1x8xf32> to vector<1x8x1xf32>
    %99 = vector.broadcast %98 : vector<1x8x1xf32> to vector<1x8x8xf32>
    %100 = arith.subf %96, %99 : vector<1x8x8xf32>
    %101 = math.exp %100 : vector<1x8x8xf32>
    %cst_50 = arith.constant dense<0.000000e+00> : vector<1x8xf32>
    %102 = vector.multi_reduction <add>, %101, %cst_50 [2] : vector<1x8x8xf32> to vector<1x8xf32>
    %103 = vector.shape_cast %102 : vector<1x8xf32> to vector<1x8x1xf32>
    %104 = tpu.reciprocal %103 {approx = true} : vector<1x8x1xf32> -> vector<1x8x1xf32>
    %105 = vector.broadcast %104 : vector<1x8x1xf32> to vector<1x8x8xf32>
    %106 = arith.mulf %101, %105 : vector<1x8x8xf32>
    %cst_51 = arith.constant 9.99999974E-5 : f32
    %107 = vector.broadcast %cst_51 : f32 to vector<1x8x8xf32>
    %108 = arith.addf %106, %107 : vector<1x8x8xf32>
    %109 = arith.mulf %108, %28 : vector<1x8x8xf32>
    %cst_52 = arith.constant dense<0.000000e+00> : vector<1x8xf32>
    %110 = vector.multi_reduction <add>, %109, %cst_52 [1] : vector<1x8x8xf32> to vector<1x8xf32>
    %111 = vector.shape_cast %110 : vector<1x8xf32> to vector<1x1x8xf32>
    %112 = arith.addf %111, %32 : vector<1x1x8xf32>
    %cst_53 = arith.constant 1.000000e+00 : f32
    %113 = vector.broadcast %cst_53 : f32 to vector<1x1x8xf32>
    %114 = arith.divf %113, %112 : vector<1x1x8xf32>
    %115 = vector.broadcast %114 : vector<1x1x8xf32> to vector<1x8x8xf32>
    %116 = arith.mulf %109, %115 : vector<1x8x8xf32>
    %cst_54 = arith.constant dense<0.000000e+00> : vector<1x8xf32>
    %117 = vector.multi_reduction <add>, %116, %cst_54 [2] : vector<1x8x8xf32> to vector<1x8xf32>
    %118 = vector.shape_cast %117 : vector<1x8xf32> to vector<1x8x1xf32>
    %119 = arith.addf %118, %34 : vector<1x8x1xf32>
    %cst_55 = arith.constant 1.000000e+00 : f32
    %120 = vector.broadcast %cst_55 : f32 to vector<1x8x1xf32>
    %121 = arith.divf %120, %119 : vector<1x8x1xf32>
    %122 = vector.broadcast %121 : vector<1x8x1xf32> to vector<1x8x8xf32>
    %123 = arith.mulf %116, %122 : vector<1x8x8xf32>
    %cst_56 = arith.constant dense<0.000000e+00> : vector<1x8xf32>
    %124 = vector.multi_reduction <add>, %123, %cst_56 [1] : vector<1x8x8xf32> to vector<1x8xf32>
    %125 = vector.shape_cast %124 : vector<1x8xf32> to vector<1x1x8xf32>
    %126 = arith.addf %125, %32 : vector<1x1x8xf32>
    %cst_57 = arith.constant 1.000000e+00 : f32
    %127 = vector.broadcast %cst_57 : f32 to vector<1x1x8xf32>
    %128 = arith.divf %127, %126 : vector<1x1x8xf32>
    %129 = vector.broadcast %128 : vector<1x1x8xf32> to vector<1x8x8xf32>
    %130 = arith.mulf %123, %129 : vector<1x8x8xf32>
    %cst_58 = arith.constant dense<0.000000e+00> : vector<1x8xf32>
    %131 = vector.multi_reduction <add>, %130, %cst_58 [2] : vector<1x8x8xf32> to vector<1x8xf32>
    %132 = vector.shape_cast %131 : vector<1x8xf32> to vector<1x8x1xf32>
    %133 = arith.addf %132, %34 : vector<1x8x1xf32>
    %cst_59 = arith.constant 1.000000e+00 : f32
    %134 = vector.broadcast %cst_59 : f32 to vector<1x8x1xf32>
    %135 = arith.divf %134, %133 : vector<1x8x1xf32>
    %136 = vector.broadcast %135 : vector<1x8x1xf32> to vector<1x8x8xf32>
    %137 = arith.mulf %130, %136 : vector<1x8x8xf32>
    %cst_60 = arith.constant dense<0.000000e+00> : vector<1x8xf32>
    %138 = vector.multi_reduction <add>, %137, %cst_60 [1] : vector<1x8x8xf32> to vector<1x8xf32>
    %139 = vector.shape_cast %138 : vector<1x8xf32> to vector<1x1x8xf32>
    %140 = arith.addf %139, %32 : vector<1x1x8xf32>
    %cst_61 = arith.constant 1.000000e+00 : f32
    %141 = vector.broadcast %cst_61 : f32 to vector<1x1x8xf32>
    %142 = arith.divf %141, %140 : vector<1x1x8xf32>
    %143 = vector.broadcast %142 : vector<1x1x8xf32> to vector<1x8x8xf32>
    %144 = arith.mulf %137, %143 : vector<1x8x8xf32>
    %cst_62 = arith.constant dense<0.000000e+00> : vector<1x8xf32>
    %145 = vector.multi_reduction <add>, %144, %cst_62 [2] : vector<1x8x8xf32> to vector<1x8xf32>
    %146 = vector.shape_cast %145 : vector<1x8xf32> to vector<1x8x1xf32>
    %147 = arith.addf %146, %34 : vector<1x8x1xf32>
    %cst_63 = arith.constant 1.000000e+00 : f32
    %148 = vector.broadcast %cst_63 : f32 to vector<1x8x1xf32>
    %149 = arith.divf %148, %147 : vector<1x8x1xf32>
    %150 = vector.broadcast %149 : vector<1x8x1xf32> to vector<1x8x8xf32>
    %151 = arith.mulf %144, %150 : vector<1x8x8xf32>
    %cst_64 = arith.constant dense<0.000000e+00> : vector<1x8xf32>
    %152 = vector.multi_reduction <add>, %151, %cst_64 [1] : vector<1x8x8xf32> to vector<1x8xf32>
    %153 = vector.shape_cast %152 : vector<1x8xf32> to vector<1x1x8xf32>
    %154 = arith.addf %153, %32 : vector<1x1x8xf32>
    %cst_65 = arith.constant 1.000000e+00 : f32
    %155 = vector.broadcast %cst_65 : f32 to vector<1x1x8xf32>
    %156 = arith.divf %155, %154 : vector<1x1x8xf32>
    %157 = vector.broadcast %156 : vector<1x1x8xf32> to vector<1x8x8xf32>
    %158 = arith.mulf %151, %157 : vector<1x8x8xf32>
    %cst_66 = arith.constant dense<0.000000e+00> : vector<1x8xf32>
    %159 = vector.multi_reduction <add>, %158, %cst_66 [2] : vector<1x8x8xf32> to vector<1x8xf32>
    %160 = vector.shape_cast %159 : vector<1x8xf32> to vector<1x8x1xf32>
    %161 = arith.addf %160, %34 : vector<1x8x1xf32>
    %cst_67 = arith.constant 1.000000e+00 : f32
    %162 = vector.broadcast %cst_67 : f32 to vector<1x8x1xf32>
    %163 = arith.divf %162, %161 : vector<1x8x1xf32>
    %164 = vector.broadcast %163 : vector<1x8x1xf32> to vector<1x8x8xf32>
    %165 = arith.mulf %158, %164 : vector<1x8x8xf32>
    %cst_68 = arith.constant dense<0.000000e+00> : vector<1x8xf32>
    %166 = vector.multi_reduction <add>, %165, %cst_68 [1] : vector<1x8x8xf32> to vector<1x8xf32>
    %167 = vector.shape_cast %166 : vector<1x8xf32> to vector<1x1x8xf32>
    %168 = arith.addf %167, %32 : vector<1x1x8xf32>
    %cst_69 = arith.constant 1.000000e+00 : f32
    %169 = vector.broadcast %cst_69 : f32 to vector<1x1x8xf32>
    %170 = arith.divf %169, %168 : vector<1x1x8xf32>
    %171 = vector.broadcast %170 : vector<1x1x8xf32> to vector<1x8x8xf32>
    %172 = arith.mulf %165, %171 : vector<1x8x8xf32>
    %cst_70 = arith.constant dense<0.000000e+00> : vector<1x8xf32>
    %173 = vector.multi_reduction <add>, %172, %cst_70 [2] : vector<1x8x8xf32> to vector<1x8xf32>
    %174 = vector.shape_cast %173 : vector<1x8xf32> to vector<1x8x1xf32>
    %175 = arith.addf %174, %34 : vector<1x8x1xf32>
    %cst_71 = arith.constant 1.000000e+00 : f32
    %176 = vector.broadcast %cst_71 : f32 to vector<1x8x1xf32>
    %177 = arith.divf %176, %175 : vector<1x8x1xf32>
    %178 = vector.broadcast %177 : vector<1x8x1xf32> to vector<1x8x8xf32>
    %179 = arith.mulf %172, %178 : vector<1x8x8xf32>
    %c216 = arith.constant 216 : index
    %c0_72 = arith.constant 0 : index
    %180 = vector.load %arg9[%c216, %c0_72] : memref<288x64xf32, #tpu.memory_space<vmem>>, vector<32x32xf32>
    %c248 = arith.constant 248 : index
    %c0_73 = arith.constant 0 : index
    %181 = vector.load %arg9[%c248, %c0_73] : memref<288x64xf32, #tpu.memory_space<vmem>>, vector<32x32xf32>
    %c280 = arith.constant 280 : index
    %c0_74 = arith.constant 0 : index
    %182 = vector.load %arg9[%c280, %c0_74] : memref<288x64xf32, #tpu.memory_space<vmem>>, vector<1x32xf32>
    "tpu.trace_start"() <{level = 10 : i32, message = "bij,bjc->bic"}> : () -> ()
    %cst_75 = arith.constant dense<0.000000e+00> : vector<1x8x32xf32>
    %183 = tpu.matmul %179, %83, %cst_75 {dimension_numbers = #tpu.dot_dimension_numbers<[2], [1], [1], [2], [0, 0, 0, 1, 1, 2], [0], [0]>} : vector<1x8x8xf32>, vector<1x8x32xf32>, vector<1x8x32xf32> -> vector<1x8x32xf32>
    "tpu.trace_stop"() : () -> ()
    "tpu.trace_start"() <{level = 10 : i32, message = "bij,bic->bjc"}> : () -> ()
    %cst_76 = arith.constant dense<0.000000e+00> : vector<1x8x32xf32>
    %184 = tpu.matmul %179, %81, %cst_76 {dimension_numbers = #tpu.dot_dimension_numbers<[1], [1], [2], [2], [0, 0, 0, 2, 1, 2], [0], [0]>} : vector<1x8x8xf32>, vector<1x8x32xf32>, vector<1x8x32xf32> -> vector<1x8x32xf32>
    "tpu.trace_stop"() : () -> ()
    %185 = vector.shape_cast %183 : vector<1x8x32xf32> to vector<8x32xf32>
    %186 = vector.shape_cast %184 : vector<1x8x32xf32> to vector<8x32xf32>
    %187 = tpu.concatenate %185, %186 in 0 : vector<8x32xf32>, vector<8x32xf32> -> vector<16x32xf32>
    %cst_77 = arith.constant dense<0.000000e+00> : vector<16x32xf32>
    %188 = tpu.matmul %86, %180, %cst_77 {dimension_numbers = #tpu.dot_dimension_numbers<[1], [0], [0], [1], [0, 0, 1, 1], [], []>} : vector<16x32xf32>, vector<32x32xf32>, vector<16x32xf32> -> vector<16x32xf32>
    %cst_78 = arith.constant dense<0.000000e+00> : vector<16x32xf32>
    %189 = tpu.matmul %187, %181, %cst_78 {dimension_numbers = #tpu.dot_dimension_numbers<[1], [0], [0], [1], [0, 0, 1, 1], [], []>} : vector<16x32xf32>, vector<32x32xf32>, vector<16x32xf32> -> vector<16x32xf32>
    %190 = arith.addf %188, %189 : vector<16x32xf32>
    %191 = vector.broadcast %182 : vector<1x32xf32> to vector<16x32xf32>
    %192 = arith.addf %190, %191 : vector<16x32xf32>
    %c144 = arith.constant 144 : index
    %c0_79 = arith.constant 0 : index
    %193 = vector.load %arg9[%c144, %c0_79] : memref<288x64xf32, #tpu.memory_space<vmem>>, vector<32x64xf32>
    %c176 = arith.constant 176 : index
    %c0_80 = arith.constant 0 : index
    %194 = vector.load %arg9[%c176, %c0_80] : memref<288x64xf32, #tpu.memory_space<vmem>>, vector<1x64xf32>
    %c184 = arith.constant 184 : index
    %c0_81 = arith.constant 0 : index
    %195 = vector.load %arg9[%c184, %c0_81] : memref<288x64xf32, #tpu.memory_space<vmem>>, vector<32x32xf32>
    %cst_82 = arith.constant dense<0.000000e+00> : vector<16x64xf32>
    %196 = tpu.matmul %192, %193, %cst_82 {dimension_numbers = #tpu.dot_dimension_numbers<[1], [0], [0], [1], [0, 0, 1, 1], [], []>} : vector<16x32xf32>, vector<32x64xf32>, vector<16x64xf32> -> vector<16x64xf32>
    %197 = vector.broadcast %194 : vector<1x64xf32> to vector<16x64xf32>
    %198 = arith.addf %196, %197 : vector<16x64xf32>
    %cst_83 = arith.constant 0.000000e+00 : f32
    %199 = vector.broadcast %cst_83 : f32 to vector<16x64xf32>
    %200 = arith.maximumf %198, %199 : vector<16x64xf32>
    %201 = vector.extract_strided_slice %200 {offsets = [0, 0], sizes = [16, 32], strides = [1, 1]} : vector<16x64xf32> to vector<16x32xf32>
    %202 = vector.extract_strided_slice %201 {offsets = [0, 0], sizes = [8, 32], strides = [1, 1]} : vector<16x32xf32> to vector<8x32xf32>
    %203 = vector.shape_cast %202 : vector<8x32xf32> to vector<1x8x32xf32>
    %204 = vector.extract_strided_slice %201 {offsets = [8, 0], sizes = [8, 32], strides = [1, 1]} : vector<16x32xf32> to vector<8x32xf32>
    %205 = vector.shape_cast %204 : vector<8x32xf32> to vector<1x8x32xf32>
    %206 = vector.extract_strided_slice %200 {offsets = [0, 32], sizes = [16, 32], strides = [1, 1]} : vector<16x64xf32> to vector<16x32xf32>
    %207 = vector.extract_strided_slice %206 {offsets = [0, 0], sizes = [8, 32], strides = [1, 1]} : vector<16x32xf32> to vector<8x32xf32>
    %208 = vector.shape_cast %207 : vector<8x32xf32> to vector<1x8x32xf32>
    %209 = vector.extract_strided_slice %206 {offsets = [8, 0], sizes = [8, 32], strides = [1, 1]} : vector<16x32xf32> to vector<8x32xf32>
    %210 = vector.shape_cast %209 : vector<8x32xf32> to vector<1x8x32xf32>
    "tpu.trace_start"() <{level = 10 : i32, message = "bij,bjc->bic"}> : () -> ()
    %cst_84 = arith.constant dense<0.000000e+00> : vector<1x8x32xf32>
    %211 = tpu.matmul %15, %203, %cst_84 {dimension_numbers = #tpu.dot_dimension_numbers<[2], [1], [1], [2], [0, 0, 0, 1, 1, 2], [0], [0]>} : vector<1x8x8xf32>, vector<1x8x32xf32>, vector<1x8x32xf32> -> vector<1x8x32xf32>
    "tpu.trace_stop"() : () -> ()
    %212 = arith.addf %211, %208 : vector<1x8x32xf32>
    "tpu.trace_start"() <{level = 10 : i32, message = "bij,bjc->bic"}> : () -> ()
    %cst_85 = arith.constant dense<0.000000e+00> : vector<1x8x32xf32>
    %213 = tpu.matmul %23, %205, %cst_85 {dimension_numbers = #tpu.dot_dimension_numbers<[2], [1], [1], [2], [0, 0, 0, 1, 1, 2], [0], [0]>} : vector<1x8x8xf32>, vector<1x8x32xf32>, vector<1x8x32xf32> -> vector<1x8x32xf32>
    "tpu.trace_stop"() : () -> ()
    %214 = arith.addf %213, %210 : vector<1x8x32xf32>
    %215 = vector.shape_cast %212 : vector<1x8x32xf32> to vector<8x32xf32>
    %cst_86 = arith.constant dense<0.000000e+00> : vector<8x32xf32>
    %216 = tpu.matmul %215, %195, %cst_86 {dimension_numbers = #tpu.dot_dimension_numbers<[1], [0], [0], [1], [0, 0, 1, 1], [], []>} : vector<8x32xf32>, vector<32x32xf32>, vector<8x32xf32> -> vector<8x32xf32>
    %217 = vector.shape_cast %216 : vector<8x32xf32> to vector<1x8x32xf32>
    "tpu.trace_start"() <{level = 10 : i32, message = "bic,bjc->bij"}> : () -> ()
    %cst_87 = arith.constant dense<0.000000e+00> : vector<1x8x8xf32>
    %218 = tpu.matmul %217, %214, %cst_87 {dimension_numbers = #tpu.dot_dimension_numbers<[2], [2], [1], [1], [0, 0, 0, 1, 1, 1], [0], [0]>} : vector<1x8x32xf32>, vector<1x8x32xf32>, vector<1x8x8xf32> -> vector<1x8x8xf32>
    "tpu.trace_stop"() : () -> ()
    %cst_88 = arith.constant 2.000000e+02 : f32
    %219 = vector.broadcast %cst_88 : f32 to vector<1x8x8xf32>
    %220 = arith.mulf %219, %218 : vector<1x8x8xf32>
    %cst_89 = arith.constant -1.000000e+30 : f32
    %221 = vector.shape_cast %30 : vector<1x1x8xi1> to vector<1x1x8xi1>
    %222 = vector.broadcast %221 : vector<1x1x8xi1> to vector<1x8x8xi1>
    %223 = vector.broadcast %cst_89 : f32 to vector<1x8x8xf32>
    %224 = arith.select %222, %220, %223 : vector<1x8x8xi1>, vector<1x8x8xf32>
    %cst_90 = arith.constant dense<0xFF800000> : vector<1x8xf32>
    %225 = vector.multi_reduction <maximumf>, %224, %cst_90 [2] : vector<1x8x8xf32> to vector<1x8xf32>
    %226 = vector.shape_cast %225 : vector<1x8xf32> to vector<1x8x1xf32>
    %227 = vector.broadcast %226 : vector<1x8x1xf32> to vector<1x8x8xf32>
    %228 = arith.subf %224, %227 : vector<1x8x8xf32>
    %229 = math.exp %228 : vector<1x8x8xf32>
    %cst_91 = arith.constant dense<0.000000e+00> : vector<1x8xf32>
    %230 = vector.multi_reduction <add>, %229, %cst_91 [2] : vector<1x8x8xf32> to vector<1x8xf32>
    %231 = vector.shape_cast %230 : vector<1x8xf32> to vector<1x8x1xf32>
    %232 = tpu.reciprocal %231 {approx = true} : vector<1x8x1xf32> -> vector<1x8x1xf32>
    %233 = vector.broadcast %232 : vector<1x8x1xf32> to vector<1x8x8xf32>
    %234 = arith.mulf %229, %233 : vector<1x8x8xf32>
    %cst_92 = arith.constant 9.99999974E-5 : f32
    %235 = vector.broadcast %cst_92 : f32 to vector<1x8x8xf32>
    %236 = arith.addf %234, %235 : vector<1x8x8xf32>
    %237 = arith.mulf %236, %28 : vector<1x8x8xf32>
    %cst_93 = arith.constant dense<0.000000e+00> : vector<1x8xf32>
    %238 = vector.multi_reduction <add>, %237, %cst_93 [1] : vector<1x8x8xf32> to vector<1x8xf32>
    %239 = vector.shape_cast %238 : vector<1x8xf32> to vector<1x1x8xf32>
    %240 = arith.addf %239, %32 : vector<1x1x8xf32>
    %cst_94 = arith.constant 1.000000e+00 : f32
    %241 = vector.broadcast %cst_94 : f32 to vector<1x1x8xf32>
    %242 = arith.divf %241, %240 : vector<1x1x8xf32>
    %243 = vector.broadcast %242 : vector<1x1x8xf32> to vector<1x8x8xf32>
    %244 = arith.mulf %237, %243 : vector<1x8x8xf32>
    %cst_95 = arith.constant dense<0.000000e+00> : vector<1x8xf32>
    %245 = vector.multi_reduction <add>, %244, %cst_95 [2] : vector<1x8x8xf32> to vector<1x8xf32>
    %246 = vector.shape_cast %245 : vector<1x8xf32> to vector<1x8x1xf32>
    %247 = arith.addf %246, %34 : vector<1x8x1xf32>
    %cst_96 = arith.constant 1.000000e+00 : f32
    %248 = vector.broadcast %cst_96 : f32 to vector<1x8x1xf32>
    %249 = arith.divf %248, %247 : vector<1x8x1xf32>
    %250 = vector.broadcast %249 : vector<1x8x1xf32> to vector<1x8x8xf32>
    %251 = arith.mulf %244, %250 : vector<1x8x8xf32>
    %cst_97 = arith.constant dense<0.000000e+00> : vector<1x8xf32>
    %252 = vector.multi_reduction <add>, %251, %cst_97 [1] : vector<1x8x8xf32> to vector<1x8xf32>
    %253 = vector.shape_cast %252 : vector<1x8xf32> to vector<1x1x8xf32>
    %254 = arith.addf %253, %32 : vector<1x1x8xf32>
    %cst_98 = arith.constant 1.000000e+00 : f32
    %255 = vector.broadcast %cst_98 : f32 to vector<1x1x8xf32>
    %256 = arith.divf %255, %254 : vector<1x1x8xf32>
    %257 = vector.broadcast %256 : vector<1x1x8xf32> to vector<1x8x8xf32>
    %258 = arith.mulf %251, %257 : vector<1x8x8xf32>
    %cst_99 = arith.constant dense<0.000000e+00> : vector<1x8xf32>
    %259 = vector.multi_reduction <add>, %258, %cst_99 [2] : vector<1x8x8xf32> to vector<1x8xf32>
    %260 = vector.shape_cast %259 : vector<1x8xf32> to vector<1x8x1xf32>
    %261 = arith.addf %260, %34 : vector<1x8x1xf32>
    %cst_100 = arith.constant 1.000000e+00 : f32
    %262 = vector.broadcast %cst_100 : f32 to vector<1x8x1xf32>
    %263 = arith.divf %262, %261 : vector<1x8x1xf32>
    %264 = vector.broadcast %263 : vector<1x8x1xf32> to vector<1x8x8xf32>
    %265 = arith.mulf %258, %264 : vector<1x8x8xf32>
    %cst_101 = arith.constant dense<0.000000e+00> : vector<1x8xf32>
    %266 = vector.multi_reduction <add>, %265, %cst_101 [1] : vector<1x8x8xf32> to vector<1x8xf32>
    %267 = vector.shape_cast %266 : vector<1x8xf32> to vector<1x1x8xf32>
    %268 = arith.addf %267, %32 : vector<1x1x8xf32>
    %cst_102 = arith.constant 1.000000e+00 : f32
    %269 = vector.broadcast %cst_102 : f32 to vector<1x1x8xf32>
    %270 = arith.divf %269, %268 : vector<1x1x8xf32>
    %271 = vector.broadcast %270 : vector<1x1x8xf32> to vector<1x8x8xf32>
    %272 = arith.mulf %265, %271 : vector<1x8x8xf32>
    %cst_103 = arith.constant dense<0.000000e+00> : vector<1x8xf32>
    %273 = vector.multi_reduction <add>, %272, %cst_103 [2] : vector<1x8x8xf32> to vector<1x8xf32>
    %274 = vector.shape_cast %273 : vector<1x8xf32> to vector<1x8x1xf32>
    %275 = arith.addf %274, %34 : vector<1x8x1xf32>
    %cst_104 = arith.constant 1.000000e+00 : f32
    %276 = vector.broadcast %cst_104 : f32 to vector<1x8x1xf32>
    %277 = arith.divf %276, %275 : vector<1x8x1xf32>
    %278 = vector.broadcast %277 : vector<1x8x1xf32> to vector<1x8x8xf32>
    %279 = arith.mulf %272, %278 : vector<1x8x8xf32>
    %cst_105 = arith.constant dense<0.000000e+00> : vector<1x8xf32>
    %280 = vector.multi_reduction <add>, %279, %cst_105 [1] : vector<1x8x8xf32> to vector<1x8xf32>
    %281 = vector.shape_cast %280 : vector<1x8xf32> to vector<1x1x8xf32>
    %282 = arith.addf %281, %32 : vector<1x1x8xf32>
    %cst_106 = arith.constant 1.000000e+00 : f32
    %283 = vector.broadcast %cst_106 : f32 to vector<1x1x8xf32>
    %284 = arith.divf %283, %282 : vector<1x1x8xf32>
    %285 = vector.broadcast %284 : vector<1x1x8xf32> to vector<1x8x8xf32>
    %286 = arith.mulf %279, %285 : vector<1x8x8xf32>
    %cst_107 = arith.constant dense<0.000000e+00> : vector<1x8xf32>
    %287 = vector.multi_reduction <add>, %286, %cst_107 [2] : vector<1x8x8xf32> to vector<1x8xf32>
    %288 = vector.shape_cast %287 : vector<1x8xf32> to vector<1x8x1xf32>
    %289 = arith.addf %288, %34 : vector<1x8x1xf32>
    %cst_108 = arith.constant 1.000000e+00 : f32
    %290 = vector.broadcast %cst_108 : f32 to vector<1x8x1xf32>
    %291 = arith.divf %290, %289 : vector<1x8x1xf32>
    %292 = vector.broadcast %291 : vector<1x8x1xf32> to vector<1x8x8xf32>
    %293 = arith.mulf %286, %292 : vector<1x8x8xf32>
    %cst_109 = arith.constant dense<0.000000e+00> : vector<1x8xf32>
    %294 = vector.multi_reduction <add>, %293, %cst_109 [1] : vector<1x8x8xf32> to vector<1x8xf32>
    %295 = vector.shape_cast %294 : vector<1x8xf32> to vector<1x1x8xf32>
    %296 = arith.addf %295, %32 : vector<1x1x8xf32>
    %cst_110 = arith.constant 1.000000e+00 : f32
    %297 = vector.broadcast %cst_110 : f32 to vector<1x1x8xf32>
    %298 = arith.divf %297, %296 : vector<1x1x8xf32>
    %299 = vector.broadcast %298 : vector<1x1x8xf32> to vector<1x8x8xf32>
    %300 = arith.mulf %293, %299 : vector<1x8x8xf32>
    %cst_111 = arith.constant dense<0.000000e+00> : vector<1x8xf32>
    %301 = vector.multi_reduction <add>, %300, %cst_111 [2] : vector<1x8x8xf32> to vector<1x8xf32>
    %302 = vector.shape_cast %301 : vector<1x8xf32> to vector<1x8x1xf32>
    %303 = arith.addf %302, %34 : vector<1x8x1xf32>
    %cst_112 = arith.constant 1.000000e+00 : f32
    %304 = vector.broadcast %cst_112 : f32 to vector<1x8x1xf32>
    %305 = arith.divf %304, %303 : vector<1x8x1xf32>
    %306 = vector.broadcast %305 : vector<1x8x1xf32> to vector<1x8x8xf32>
    %307 = arith.mulf %300, %306 : vector<1x8x8xf32>
    %c0_113 = arith.constant 0 : index
    %c0_114 = arith.constant 0 : index
    %c0_115 = arith.constant 0 : index
    %308 = vector.load %arg10[%c0_113, %c0_114, %c0_115] : memref<1x8x8xf32, #tpu.memory_space<vmem>>, vector<1x8x8xf32>
    tpu.vector_store %arg10[%c0_113, %c0_114, %c0_115], %307 {strides = array<i32>} : memref<1x8x8xf32, #tpu.memory_space<vmem>>, vector<1x8x8xf32>,
    return
  }
  func.func @transform_0(%arg0: i32) -> (i32, i32, i32) {
    %c0_i32 = arith.constant 0 : i32
    %c0_i32_0 = arith.constant 0 : i32
    %c0_i32_1 = arith.constant 0 : i32
    return %arg0, %c0_i32, %c0_i32_0 : i32, i32, i32
  }
  func.func @transform_1(%arg0: i32) -> (i32, i32, i32) {
    %c0_i32 = arith.constant 0 : i32
    %c0_i32_0 = arith.constant 0 : i32
    %c0_i32_1 = arith.constant 0 : i32
    return %arg0, %c0_i32, %c0_i32_0 : i32, i32, i32
  }
  func.func @transform_2(%arg0: i32) -> (i32, i32, i32) {
    %c0_i32 = arith.constant 0 : i32
    %c0_i32_0 = arith.constant 0 : i32
    %c0_i32_1 = arith.constant 0 : i32
    return %arg0, %c0_i32, %c0_i32_0 : i32, i32, i32
  }
  func.func @transform_3(%arg0: i32) -> (i32, i32, i32) {
    %c0_i32 = arith.constant 0 : i32
    %c0_i32_0 = arith.constant 0 : i32
    %c0_i32_1 = arith.constant 0 : i32
    return %arg0, %c0_i32, %c0_i32_0 : i32, i32, i32
  }
  func.func @transform_4(%arg0: i32) -> (i32, i32, i32) {
    %c0_i32 = arith.constant 0 : i32
    %c0_i32_0 = arith.constant 0 : i32
    %c0_i32_1 = arith.constant 0 : i32
    return %arg0, %c0_i32, %c0_i32_0 : i32, i32, i32
  }
  func.func @transform_5(%arg0: i32) -> (i32, i32, i32) {
    %c0_i32 = arith.constant 0 : i32
    %c0_i32_0 = arith.constant 0 : i32
    %c0_i32_1 = arith.constant 0 : i32
    return %arg0, %c0_i32, %c0_i32_0 : i32, i32, i32
  }
  func.func @transform_6(%arg0: i32) -> (i32, i32, i32) {
    %c0_i32 = arith.constant 0 : i32
    %c0_i32_0 = arith.constant 0 : i32
    %c0_i32_1 = arith.constant 0 : i32
    return %arg0, %c0_i32, %c0_i32_0 : i32, i32, i32
  }
  func.func @transform_7(%arg0: i32) -> (i32, i32, i32) {
    %c0_i32 = arith.constant 0 : i32
    %c0_i32_0 = arith.constant 0 : i32
    %c0_i32_1 = arith.constant 0 : i32
    return %arg0, %c0_i32, %c0_i32_0 : i32, i32, i32
  }
  func.func @transform_8(%arg0: i32) -> (i32, i32) {
    %c0_i32 = arith.constant 0 : i32
    %c0_i32_0 = arith.constant 0 : i32
    %c0_i32_1 = arith.constant 0 : i32
    return %c0_i32, %c0_i32_0 : i32, i32
  }
  func.func @transform_9(%arg0: i32) -> (i32, i32, i32) {
    %c0_i32 = arith.constant 0 : i32
    %c0_i32_0 = arith.constant 0 : i32
    %c0_i32_1 = arith.constant 0 : i32
    return %arg0, %c0_i32, %c0_i32_0 : i32, i32, i32
  }
}

</mosaic_0001>

<bundles_post_ra>
// kernel: tpu_custom_call.1
= control target key start
LH: loop header
LB: loop body
LE: loop exit
PB: predicated region body
PF: predicated region fallthrough
CT: control target
= control target key end

     0   :  { %14 = vsyncpa [#allocation3], 0  ;;  %s3345_s0 = inlined_call_operand.vmem [shape: f32[2,8,1], index: 0, kind: input, shape index: {}]   ;;  %s3346_s1 = inlined_call_operand.vmem [shape: f32[2,1,8], index: 1, kind: input, shape index: {}]   ;;  %s3347_s2 = inlined_call_operand.vmem [shape: f32[2,8,32], index: 2, kind: input, shape index: {}]   ;;  %s3348_s3 = inlined_call_operand.vmem [shape: f32[2,8,32], index: 3, kind: input, shape index: {}]   ;;  %s3349_s4 = inlined_call_operand.vmem [shape: f32[2,8,16], index: 4, kind: input, shape index: {}]   ;;  %s3350_s5 = inlined_call_operand.vmem [shape: f32[2,8,16], index: 5, kind: input, shape index: {}]   ;;  %s3351_s6 = inlined_call_operand.vmem [shape: f32[2,8,16], index: 6, kind: input, shape index: {}]   ;;  %s3352_s7 = inlined_call_operand.vmem [shape: f32[2,8,16], index: 7, kind: input, shape index: {}]   ;;  %s3353_s8 = inlined_call_operand.vmem [shape: f32[288,64], index: 8, kind: input, shape index: {}]   ;;  %s3354_s9 = inlined_call_operand.hbm [shape: f32[2,8,8], index: 9, kind: output, shape index: {}]  }
   0x1   :  { %16 = vsyncpa [#allocation3 + $0x1], 0  ;;  %s2949_s30 = smov 0   ;;  %s2951_s10 = smov 0  }
   0x2   :  { %s2953_s11 = smov 0   ;;  %s2955_s12 = smov 0  }
   0x3 LB: > { %3359 = sst [smem:[#allocation5_spill]] %s2888_s11  ;;  %s2970_s13 = sadd.s32 4294967295, %s2892_s12   ;;  %s2892_s12 = sphi %s2955_s12, %s3368_s12   ;;  %s2888_s11 = sphi %s2953_s11, %s3370_s11   ;;  %s2884_s10 = sphi %s2951_s10, %s3372_s10   ;;  %s2880_s30 = sphi %s2949_s30, %s3371_s30  }
   0x4   : > { %s2486_s14 = sadd.s32 4294967294, %s2892_s12   ;;  %s2974_s15 = sadd.s32 1, %s2892_s12  }
   0x5   : > { %3360 = sst [smem:[#allocation6_spill]] %s2974_s15  ;;  %s258_s16 = sadd.s32 1, %s2888_s11 }
   0x6   : > { %s255_s17 = ssub.s32 %s2892_s12, %s2974_s15  ;;  %p268_p0 = scmp.ne.s32.totalorder %s2888_s11, %s2884_s10 }
   0x7   : > { %p256_p1 = scmp.eq.s32.totalorder %s255_s17, 0  ;;  %p269_p2 = scmp.eq.s32.totalorder %s2970_s13, 1 }
   0x8   : > { %p274_p3 = scmp.ne.s32.totalorder %s2884_s10, %s2880_s30  ;;  %p275_p4 = scmp.eq.s32.totalorder %s2486_s14, 1 }
   0x9   : > { %s2985_s18 = scalar_select %p256_p1, %s2888_s11, %s258_s16  }
   0xa   : > { %p2987_p5 = por %p269_p2, %p268_p0  ;;  %p2991_p6 = por %p275_p4, %p274_p3 }
   0xb   : > { %3361 = sst [smem:[#allocation7_spill]] %s2985_s18  ;;  %p2489_p7 = scmp.ge.s32.totalorder %s2892_s12, 1 }
   0xc   : > { %s3363_s20 = scalar_select %p2991_p6, 1, 0 }
   0xd   : > { %p351_p8 = scmp.lt.s32.totalorder %s2892_s12, 3 }
   0xe   : > { %3364 = sst [smem:[#allocation8_spill]] %s3363_s20 }
   0xf   : > { %p352_p9 = pnand %p2489_p7, %p351_p8 }
  0x10   : > { %p413_p10 = scmp.lt.s32.totalorder (!%p352_p9), %s2970_s13, 1  ;;  %s2531_s27 = sshll.u32 (!%p352_p9), %s2970_s13, 7 }
  0x11   : > { %355 = sbr.rel (%p352_p9) target bundleno = 6326 (0x18b6), region = 56 }
  0x16   : > { %v2894_v0 = vmov 0.0   ;;  %s3001_s21 = scalar_select %p413_p10, %s2970_s13, 1  ;;  %vm2895_vm0 = vmmov 0   ;;  %vm448_vm1 = vcmask 130048   ;;  %v646_v1 = vld [vmem:[%s3353_s8 + $0x18] sm:$0xff]  ;;  %vm652_vm2 = vcmask 261120  }
  0x17   : > { %2598 = vmatprep.subr.mxu0 %v2894_v0  ;;  %2603 = vmatprep.subr.mxu1 %v2894_v0  ;;  %v645_v7 = vld [vmem:[%s3353_s8 + $0x10] sm:$0xff]  ;;  %v644_v8 = vld [vmem:[%s3353_s8 + $0x8] sm:$0xff]  ;;  %v643_v9 = vld [vmem:[%s3353_s8] sm:$0xff]  ;;  %vm604_vm3 = vcmask 64512  }
  0x18   : > { %2600 = vmatprep.mubr.msk.f32.mxu0 %vm2895_vm0, %v2894_v0  ;;  %2605 = vmatprep.mubr.msk.f32.mxu1 %vm2895_vm0, %v2894_v0  ;;  %s3008_s22 = sshll.u32 %s3001_s21, 3  ;;  %v893_v21 = vld [vmem:[%s3353_s8 + $0x60] sm:$0xff]  ;;  %v892_v45 = vld [vmem:[%s3353_s8 + $0x58] sm:$0xff]  ;;  %v891_v46 = vld [vmem:[%s3353_s8 + $0x50] sm:$0xff] }
  0x19   : > { %s435_s25 = scalar_lea.vmem %s3350_s5, %s3008_s22  ;;  %s443_s28 = scalar_lea.vmem %s3352_s7, %s3008_s22  ;;  %v2502_v27 = vld [vmem:[%s3353_s8 + $0x20] ss:$0 sm:$0xff]  ;;  %v890_v47 = vld [vmem:[%s3353_s8 + $0x48] sm:$0xff]  ;;  %v896_v58 = vld [vmem:[%s3353_s8 + $0x78] sm:$0xff] }
  0x1a   : > { %v447_v2 = vld [vmem:[%s435_s25] sm:$0xff]  ;;  %s431_s18 = scalar_lea.vmem %s3349_s4, %s3008_s22  ;;  %s439_s20 = scalar_lea.vmem %s3351_s6, %s3008_s22  ;;  %v898_v56 = vld [vmem:[%s3353_s8 + $0x88] sm:$0xff] }
  0x1b   : > { %v526_v3 = vld [vmem:[%s443_s28] sm:$0xff]  ;;  %2599 = vmatpush3.xpose.msk.msra.mxu0 %vm448_vm1, %v447_v2  ;;  %s423_s25 = scalar_lea.vmem %s3347_s2, %s3008_s22  ;;  %s427_s28 = scalar_lea.vmem %s3348_s3, %s3008_s22  ;;  %v2507_v60 = vld [vmem:[%s3353_s8 + $0x68] ss:$0 sm:$0xff] }
  0x1c   : > { %2604 = vmatpush3.xpose.msk.msra.mxu1 %vm448_vm1, %v526_v3  ;;  %v446_v4 = vld [vmem:[%s431_s18] sm:$0xff]  ;;  %2608 = vmatprep.subr.mxu0 %v646_v1  ;;  %v895_v3 = vld [vmem:[%s3353_s8 + $0x70] sm:$0xff]  ;;  %s416_s29 = scalar_lea.vmem %s3345_s0, %s3008_s22  ;;  %s2898_s22 = smov [#allocation2]  }
  0x1d   : > { %v525_v5 = vld [vmem:[%s439_s20] sm:$0xff]  ;;  %2619 = vmatprep.subr.mxu1 %v2894_v0  ;;  %s419_s20 = scalar_lea.vmem %s3346_s1, %s3001_s21  ;;  %s2344_s21 = scalar_lea.hbm %s3354_s9, %s2531_s27 }
  0x1e   : > { %v444_v6 = vld [vmem:[%s423_s25] sm:$0xff]  ;;  %2601 = vmatmul.mubr.msk.f32.vlgmr.msra.gmra.mxu0 %vm448_vm1, %v446_v4  ;;  %s2896_s25 = smov 96   ;;  %s2836_s14 = sshll.u32 %s2898_s22, 4  ;;  %s2837_s14 = int_to_ptr.vmem [resolvable:$false] %s2836_s14 }
  0x1f   : > { %2606 = vmatmul.mubr.msk.f32.vlgmr.msra.gmra.mxu1 %vm448_vm1, %v525_v5  ;;  %2609 = vmatpush3.msra.mxu0 %v646_v1  ;;  %v445_v10 = vld [vmem:[%s427_s28] sm:$0xff]  ;;  %s2838_s13 = scalar_lea.vmem %s2837_s14, 256 }
  0x20   : > { %2616 = vmatprep.mubr.msk.f32.mxu0 %vm652_vm2, %v444_v6  ;;  %2610 = vmatprep.subr.mxu0 %v645_v7  ;;  %v897_v57 = vld [vmem:[%s3353_s8 + $0x80] sm:$0xff] }
  0x21   : > { %2621 = vmatprep.mubr.msk.f32.mxu1 %vm2895_vm0, %v2894_v0  ;;  %2611 = vmatpush3.msra.mxu0 %v645_v7 }
  0x22   : > { %2612 = vmatprep.subr.mxu0 %v644_v8 }
  0x23   : > { %2613 = vmatpush3.msra.mxu0 %v644_v8 }
  0x24   : > { %2614 = vmatprep.subr.mxu0 %v643_v9 }
  0x25   : > { %2615 = vmatpush3.msra.mxu0 %v643_v9 }
  0x26   : > { %2617 = vmatmul.mubr.msk.f32.vlgmr.msra.gmra.mxu0 %vm652_vm2, %v445_v10  ;;  %2629 = vmatprep.subr.mxu0 %v893_v21 }
  0x27   : > { %2630 = vmatpush3.msra.mxu0 %v893_v21 }
  0x28   : > { %2631 = vmatprep.subr.mxu0 %v892_v45 }
  0x29   : > { %2632 = vmatpush3.msra.mxu0 %v892_v45 }
  0x2a   : > { %2633 = vmatprep.subr.mxu0 %v891_v46 }
  0x2b   : > { %2634 = vmatpush3.msra.mxu0 %v891_v46 }
  0x2c   : > { %2635 = vmatprep.subr.mxu0 %v890_v47 }
  0x2d   : > { %2636 = vmatpush3.msra.mxu0 %v890_v47 }
  0x2e   : > { %2650 = vmatprep.subr.mxu0 %v2894_v0 }
  0xde   : > { %v521_v11 = vpop.f32.mrf.mxu0 }
  0xdf   : > { %v599_v12 = vpop.f32.mrf.mxu1  ;;  %v603_v13 = vand.u32 2147483647, %v521_v11 }
  0xe0   : > { %v615_v14 = vand.u32 2147483647, %v599_v12  ;;  %v2602_v15 = vpop.f32.mrf.mxu0 }
  0xe1   : > { %v2607_v16 = vpop.f32.mrf.mxu1  ;;  %v605_v17 = vsel %vm604_vm3, %v603_v13, 0.0  ;;  %v634_v15 = vlaneseq }
  0xe2   : > { %v616_v18 = vsel %vm604_vm3, %v615_v14, 0.0  ;;  %v606_v19 = vrot.slane %v605_v17, 4  ;;  %v2897_v14 = vmov 0   ;;  %v627_v16 = vld [vmem:[%s419_s20] sm:$0x1] }
  0xe3   : > { %v617_v20 = vrot.slane %v616_v18, 4  ;;  %2778 = vset.pattern.permute.xlu0 %v2897_v14  ;;  %2779 = vset.pattern.permute.xlu1 %v2897_v14  ;;  %vm640_vm4 = vcmp.gt.f32.partialorder %v627_v16, 0.5 }
  0xe4   : > { %v607_v22 = vadd.f32 %v606_v19, %v605_v17  ;;  %v635_v17 = vshrl.u32 %v634_v15, 7  ;;  %v1284_v19 = vsel %vm640_vm4, 1, %v2897_v14 }
  0xe5   : > { %v618_v23 = vadd.f32 %v617_v20, %v616_v18 }
  0xe6   : > { %v608_v24 = vrot.slane %v607_v22, 2  ;;  %v2618_v26 = vpop.f32.mrf.mxu0  ;;  %v3144_v18 = vsub.s32 0, %v635_v17 }
  0xe7   : > { %v619_v25 = vrot.slane %v618_v23, 2  ;;  %v731_v31 = vadd.f32 %v2618_v26, %v2502_v27 }
  0xe8   : > { %v609_v28 = vadd.f32 %v608_v24, %v607_v22  ;;  %v725_v30 = vpop.f32.mrf.mxu0  ;;  %v1288_v20 = vrot.slane %v1284_v19, %v3144_v18 }
  0xe9   : > { %v620_v29 = vadd.f32 %v619_v25, %v618_v23  ;;  %v726_v32 = vadd.f32 %v2502_v27, %v725_v30  ;;  %v735_v38 = vmax.f32 %v731_v31, 0.0  ;;  %v626_v27 = vld [vmem:[%s416_s29] sm:$0xff] }
  0xea   : > { %v610_v33 = vrot.slane %v609_v28, 1  ;;  %vm3147_vm5 = vcmp.eq.s32.totalorder %v1288_v20, 1 }
  0xeb   : > { %v621_v34 = vrot.slane %v620_v29, 1  ;;  %v734_v35 = vmax.f32 %v726_v32, 0.0 }
  0xec   : > { %v611_v36 = vadd.f32 %v610_v33, %v609_v28 }
  0xed   : > { %v622_v37 = vadd.f32 %v621_v34, %v620_v29  ;;  %737 = vrot.lane.b32.xlu0 %v734_v35, %s2896_s25  ;;  %2620 = vmatpush3.msra.mxu1 %v734_v35  ;;  %v637_v34 = vrot.slane %v627_v16, %v3144_v18 }
  0xee   : > { %v612_v39 = vmax.f32 %v611_v36, 1e-12  ;;  %2624 = vmatprep.subr.mxu1 %v2894_v0 }
  0xef   : > { %v623_v40 = vmax.f32 %v622_v37, 1e-12 }
  0xf0   : > { %2780 = vrcp.f32 %v612_v39 }
  0xf1   : > { %814 = vrot.lane.b32.xlu0 %v735_v38, %s2896_s25  ;;  %2782 = vrcp.f32 %v623_v40 }
  0xfd   : > { %v2781_v41 = vpop.eup %2780 }
  0xfe   : > { %v3066_v42 = vmul.f32 %v2781_v41, %v521_v11  ;;  %v2783_v43 = vpop.eup %2782 }
  0xff   : > { %v3072_v44 = vmul.f32 %v2783_v43, %v599_v12 }
 0x100   : > { %2622 = vmatmul.mubr.msk.f32.vlgmr.msra.gmra.mxu1 %vm604_vm3, %v3066_v42 }
 0x101   : > { %2625 = vmatpush3.msra.mxu1 %v735_v38  ;;  %2626 = vmatprep.mubr.msk.f32.mxu1 %vm2895_vm0, %v2894_v0 }
 0x102   : > { %2640 = vmatprep.subr.mxu1 %v2894_v0 }
 0x104   : > { %2627 = vmatmul.mubr.msk.f32.vlgmr.msra.gmra.mxu1 %vm604_vm3, %v3072_v44 }
 0x105   : > { %2642 = vmatprep.mubr.msk.f32.mxu1 %vm2895_vm0, %v2894_v0 }
 0x15f   : > { %v738_v48 = vpop.permute.xlu0 %737 }
 0x163   : > { %v815_v52 = vpop.permute.xlu0 %814 }
 0x1c0   : > { %v809_v49 = vpop.f32.mrf.mxu1 }
 0x1c1   : > { %v810_v50 = vadd.f32 %v809_v49, %v738_v48  ;;  %v3164_v48 = vsub.f32 1.0, %v627_v16 }
 0x1c2   : > { %v2623_v51 = vpop.f32.mrf.mxu1 }
 0x1c3   : > { %2637 = vmatprep.mubr.msk.f32.mxu0 %vm652_vm2, %v810_v50 }
 0x1c4   : > { %v886_v53 = vpop.f32.mrf.mxu1 }
 0x1c5   : > { %v887_v54 = vadd.f32 %v886_v53, %v815_v52 }
 0x1c6   : > { %v2628_v55 = vpop.f32.mrf.mxu1 }
 0x1c7   : > { %2638 = vmatmul.mubr.msk.f32.vlgmr.msra.gmra.mxu0 %vm652_vm2, %v887_v54 }
 0x1c8   : > { %2658 = vmatprep.mubr.msk.f32.mxu0 %vm2895_vm0, %v2894_v0  ;;  %2651 = vmatpush3.msra.mxu0 %v898_v56  ;;  %v3169_v56 = vsub.f32 1.0, %v626_v27 }
 0x1c9   : > { %2652 = vmatprep.subr.mxu0 %v2894_v0 }
 0x1ca   : > { %2653 = vmatpush3.msra.mxu0 %v897_v57 }
 0x1cb   : > { %2654 = vmatprep.subr.mxu0 %v2894_v0 }
 0x1cc   : > { %2655 = vmatpush3.msra.mxu0 %v896_v58 }
 0x1cd   : > { %2656 = vmatprep.subr.mxu0 %v2894_v0 }
 0x1ce   : > { %2657 = vmatpush3.msra.mxu0 %v895_v3 }
 0x1cf   : > { %2671 = vmatprep.subr.mxu0 %v2894_v0 }
 0x287   : > { %v2639_v59 = vpop.f32.mrf.mxu0 }
 0x288   : > { %v981_v62 = vadd.f32 %v2639_v59, %v2507_v60 }
 0x289   : > { %v975_v61 = vpop.f32.mrf.mxu0 }
 0x28a   : > { %v976_v63 = vadd.f32 %v2507_v60, %v975_v61  ;;  %v985_v2 = vmax.f32 %v981_v62, 0.0 }
 0x28c   : > { %v984_v1 = vmax.f32 %v976_v63, 0.0 }
 0x28e   : > { %987 = vrot.lane.b32.xlu1 %v984_v1, %s2896_s25  ;;  %2641 = vmatpush3.msra.mxu1 %v984_v1 }
 0x28f   : > { %2643 = vmatmul.mubr.msk.f32.vlgmr.msra.gmra.mxu1 %vm604_vm3, %v3066_v42  ;;  %2645 = vmatprep.subr.mxu1 %v2894_v0 }
 0x290   : > { %2646 = vmatpush3.msra.mxu1 %v985_v2  ;;  %2647 = vmatprep.mubr.msk.f32.mxu1 %vm2895_vm0, %v2894_v0 }
 0x291   : > { %2661 = vmatprep.subr.mxu1 %v2894_v0 }
 0x292   : > { %1061 = vrot.lane.b32.xlu1 %v985_v2, %s2896_s25 }
 0x293   : > { %2648 = vmatmul.mubr.msk.f32.vlgmr.msra.gmra.mxu1 %vm604_vm3, %v3072_v44 }
 0x294   : > { %2663 = vmatprep.mubr.msk.f32.mxu1 %vm2895_vm0, %v2894_v0 }
 0x300   : > { %v988_v4 = vpop.permute.xlu1 %987 }
 0x304   : > { %v1062_v8 = vpop.permute.xlu1 %1061 }
 0x34f   : > { %v1056_v5 = vpop.f32.mrf.mxu1 }
 0x350   : > { %v3124_v6 = vadd.f32 %v1056_v5, %v988_v4 }
 0x351   : > { %v2644_v7 = vpop.f32.mrf.mxu1 }
 0x352   : > { %2659 = vmatmul.mubr.msk.f32.vlgmr.msra.gmra.mxu0 %vm652_vm2, %v3124_v6 }
 0x353   : > { %2672 = vmatpush3.msra.mxu0 %v3124_v6  ;;  %v1130_v9 = vpop.f32.mrf.mxu1  ;;  %2673 = vmatprep.mubr.msk.f32.mxu0 %vm2895_vm0, %v2894_v0 }
 0x354   : > { %v3131_v10 = vadd.f32 %v1130_v9, %v1062_v8 }
 0x355   : > { %v2649_v11 = vpop.f32.mrf.mxu1 }
 0x356   : > { %2662 = vmatpush3.xpose.msk.msra.mxu1 %vm652_vm2, %v3131_v10 }
 0x357   : > { %2666 = vmatprep.subr.mxu1 %v2894_v0 }
 0x412   : > { %v1203_v12 = vpop.f32.mrf.mxu0 }
 0x413   : > { %2664 = vmatmul.mubr.msk.f32.vlgmr.msra.gmra.mxu1 %vm652_vm2, %v1203_v12 }
 0x414   : > { %2667 = vmatpush3.msra.mxu1 %v3131_v10  ;;  %v2660_v13 = vpop.f32.mrf.mxu0  ;;  %2668 = vmatprep.mubr.msk.f32.mxu1 %vm2895_vm0, %v2894_v0 }
 0x4d3   : > { %v1279_v21 = vpop.f32.mrf.mxu1 }
 0x4d4   : > { %v1283_v23 = vmul.f32 200.0, %v1279_v21 }
 0x4d5   : > { %v2665_v24 = vpop.f32.mrf.mxu1 }
 0x4d6   : > { %v1290_v25 = vsel %vm3147_vm5, %v1283_v23, -1e+30 }
 0x4d7   : > { %v1291_v26 = vsel %vm604_vm3, %v1290_v25, -inf }
 0x4d8   : > { %1292 = vmax.xlane.f32.xlu0 %v1291_v26 }
 0x4ee   : > { %630 = vperm.xlu0 %2778, %v626_v27  }
 0x561   : > { %v1293_v28 = vpop.xlane.xlu0 %1292 }
 0x562   : > { %v1294_v29 = vsub.f32 %v1290_v25, %v1293_v28 }
 0x564   : > { %v1295_v30 = vmul.f32 1.442695, %v1294_v29 }
 0x566   : > { %2784 = vpow2.f32 %v1295_v30 }
 0x569   : > { %v631_v35 = vpop.permute.xlu0 %630 }
 0x56a   : > { %v3160_v38 = vmul.f32 %v637_v34, %v631_v35 }
 0x573   : > { %v2785_v31 = vpop.eup %2784 }
 0x574   : > { %v1297_v32 = vsel %vm604_vm3, %v2785_v31, 0.0 }
 0x575   : > { %1298 = vadd.xlane.f32.xlu1 %v1297_v32 }
 0x5fe   : > { %v1299_v33 = vpop.xlane.xlu1 %1298 }
 0x5ff   : > { %2786 = vrcp.f32 %v1299_v33 }
 0x60c   : > { %v2787_v36 = vpop.eup %2786 }
 0x60d   : > { %v1301_v37 = vmul.f32 %v2787_v36, %v2785_v31 }
 0x60f   : > { %v1302_v39 = vadd.f32 0.0001, %v1301_v37 }
 0x611   : > { %v1303_v40 = vmul.f32 %v1302_v39, %v3160_v38 }
 0x613   : > { %v1304_v41 = vsel %vm604_vm3, %v1303_v40, 0.0 }
 0x614   : > { %v1305_v43 = vrot.slane %v1304_v41, 4 }
 0x616   : > { %v1306_v45 = vadd.f32 %v1305_v43, %v1304_v41 }
 0x618   : > { %v1307_v46 = vrot.slane %v1306_v45, 2 }
 0x61a   : > { %v1308_v47 = vadd.f32 %v1307_v46, %v1306_v45 }
 0x61c   : > { %v1309_v49 = vrot.slane %v1308_v47, 1 }
 0x61e   : > { %v1310_v50 = vadd.f32 %v1309_v49, %v1308_v47 }
 0x620   : > { %v1311_v51 = vadd.f32 %v1310_v50, %v3164_v48 }
 0x622   : > { %2788 = vrcp.f32 %v1311_v51 }
 0x62f   : > { %v2789_v52 = vpop.eup %2788 }
 0x630   : > { %v1317_v53 = vrot.slane %v2789_v52, %v3144_v18 }
 0x632   : > { %v1318_v54 = vmul.f32 %v1317_v53, %v1303_v40 }
 0x634   : > { %v1319_v55 = vsel %vm604_vm3, %v1318_v54, 0.0 }
 0x635   : > { %1320 = vadd.xlane.f32.xlu1 %v1319_v55 }
 0x6be   : > { %v1321_v57 = vpop.xlane.xlu1 %1320 }
 0x6bf   : > { %v1322_v58 = vadd.f32 %v1321_v57, %v3169_v56 }
 0x6c1   : > { %2790 = vrcp.f32 %v1322_v58 }
 0x6ce   : > { %v2791_v59 = vpop.eup %2790 }
 0x6cf   : > { %1327 = vperm.xlu1 %2779, %v2791_v59  }
 0x74a   : > { %v1328_v60 = vpop.permute.xlu1 %1327 }
 0x74b   : > { %v1330_v61 = vmul.f32 %v1328_v60, %v1318_v54 }
 0x74d   : > { %v1331_v62 = vsel %vm604_vm3, %v1330_v61, 0.0 }
 0x74e   : > { %v1332_v63 = vrot.slane %v1331_v62, 4 }
 0x750   : > { %v1333_v1 = vadd.f32 %v1332_v63, %v1331_v62 }
 0x752   : > { %v1334_v2 = vrot.slane %v1333_v1, 2 }
 0x754   : > { %v1335_v3 = vadd.f32 %v1334_v2, %v1333_v1 }
 0x756   : > { %v1336_v4 = vrot.slane %v1335_v3, 1 }
 0x758   : > { %v1337_v5 = vadd.f32 %v1336_v4, %v1335_v3 }
 0x75a   : > { %v1338_v7 = vadd.f32 %v1337_v5, %v3164_v48 }
 0x75c   : > { %2792 = vrcp.f32 %v1338_v7 }
 0x769   : > { %v2793_v8 = vpop.eup %2792 }
 0x76a   : > { %v1344_v9 = vrot.slane %v2793_v8, %v3144_v18 }
 0x76c   : > { %v1345_v11 = vmul.f32 %v1344_v9, %v1330_v61 }
 0x76e   : > { %v1346_v12 = vsel %vm604_vm3, %v1345_v11, 0.0 }
 0x76f   : > { %1347 = vadd.xlane.f32.xlu1 %v1346_v12  ;;  %v1442_v12 = vld [vmem:[%s3353_s8 + $0xf0] sm:$0xff] }
 0x770   : > { %2687 = vmatprep.subr.mxu0 %v1442_v12 }
 0x7f8   : > { %v1348_v13 = vpop.xlane.xlu1 %1347 }
 0x7f9   : > { %v1349_v14 = vadd.f32 %v1348_v13, %v3169_v56 }
 0x7fb   : > { %2794 = vrcp.f32 %v1349_v14 }
 0x808   : > { %v2795_v15 = vpop.eup %2794 }
 0x809   : > { %1354 = vperm.xlu0 %2778, %v2795_v15  }
 0x884   : > { %v1355_v16 = vpop.permute.xlu0 %1354 }
 0x885   : > { %v1357_v17 = vmul.f32 %v1355_v16, %v1345_v11  ;;  %v1446_v16 = vld [vmem:[%s3353_s8 + $0x110] sm:$0xff] }
 0x886   : > { %2676 = vmatprep.subr.mxu1 %v1446_v16 }
 0x887   : > { %v1358_v19 = vsel %vm604_vm3, %v1357_v17, 0.0 }
 0x888   : > { %v1359_v20 = vrot.slane %v1358_v19, 4 }
 0x88a   : > { %v1360_v21 = vadd.f32 %v1359_v20, %v1358_v19  ;;  %v1444_v19 = vld [vmem:[%s3353_s8 + $0x100] sm:$0xff]  ;;  %v1443_v20 = vld [vmem:[%s3353_s8 + $0xf8] sm:$0xff] }
 0x88c   : > { %v1361_v23 = vrot.slane %v1360_v21, 2 }
 0x88e   : > { %v1362_v24 = vadd.f32 %v1361_v23, %v1360_v21  ;;  %v1441_v23 = vld [vmem:[%s3353_s8 + $0xe8] sm:$0xff] }
 0x890   : > { %v1363_v25 = vrot.slane %v1362_v24, 1 }
 0x892   : > { %v1364_v26 = vadd.f32 %v1363_v25, %v1362_v24  ;;  %v1440_v24 = vld [vmem:[%s3353_s8 + $0xe0] sm:$0xff]  ;;  %v1439_v25 = vld [vmem:[%s3353_s8 + $0xd8] sm:$0xff] }
 0x894   : > { %v1365_v27 = vadd.f32 %v1364_v26, %v3164_v48 }
 0x896   : > { %2796 = vrcp.f32 %v1365_v27 }
 0x8a3   : > { %v2797_v28 = vpop.eup %2796 }
 0x8a4   : > { %v1371_v29 = vrot.slane %v2797_v28, %v3144_v18 }
 0x8a6   : > { %v1372_v30 = vmul.f32 %v1371_v29, %v1357_v17  ;;  %v1445_v17 = vld [vmem:[%s3353_s8 + $0x108] sm:$0xff] }
 0x8a7   : > { %v1791_v29 = vld [vmem:[%s3353_s8 + $0xa8] sm:$0xff] }
 0x8a8   : > { %v1373_v31 = vsel %vm604_vm3, %v1372_v30, 0.0 }
 0x8a9   : > { %1374 = vadd.xlane.f32.xlu0 %v1373_v31  ;;  %v1788_v31 = vld [vmem:[%s3353_s8 + $0x90] sm:$0xff] }
 0x932   : > { %v1375_v32 = vpop.xlane.xlu0 %1374 }
 0x933   : > { %v1376_v33 = vadd.f32 %v1375_v32, %v3169_v56 }
 0x935   : > { %2798 = vrcp.f32 %v1376_v33 }
 0x942   : > { %v2799_v34 = vpop.eup %2798 }
 0x943   : > { %1381 = vperm.xlu1 %2779, %v2799_v34  }
 0x9be   : > { %v1382_v35 = vpop.permute.xlu1 %1381 }
 0x9bf   : > { %v1384_v36 = vmul.f32 %v1382_v35, %v1372_v30  ;;  %v1789_v30 = vld [vmem:[%s3353_s8 + $0x98] sm:$0xff] }
 0x9c1   : > { %v1385_v37 = vsel %vm604_vm3, %v1384_v36, 0.0 }
 0x9c2   : > { %v1386_v39 = vrot.slane %v1385_v37, 4 }
 0x9c4   : > { %v1387_v40 = vadd.f32 %v1386_v39, %v1385_v37  ;;  %v2521_v37 = vld [vmem:[%s3353_s8 + $0x118] ss:$0 sm:$0xff] }
 0x9c6   : > { %v1388_v41 = vrot.slane %v1387_v40, 2 }
 0x9c8   : > { %v1389_v43 = vadd.f32 %v1388_v41, %v1387_v40 }
 0x9ca   : > { %v1390_v45 = vrot.slane %v1389_v43, 1 }
 0x9cc   : > { %v1391_v46 = vadd.f32 %v1390_v45, %v1389_v43  ;;  %v1796_v43 = vld [vmem:[%s3353_s8 + $0xd0] sm:$0xff]  ;;  %v1795_v45 = vld [vmem:[%s3353_s8 + $0xc8] sm:$0xff] }
 0x9ce   : > { %v1392_v47 = vadd.f32 %v1391_v46, %v3164_v48 }
 0x9d0   : > { %2800 = vrcp.f32 %v1392_v47  ;;  %v2522_v47 = vld [vmem:[%s3353_s8 + $0xb0] ss:$0 sm:$0xff] }
 0x9dd   : > { %v2801_v49 = vpop.eup %2800 }
 0x9de   : > { %v1398_v50 = vrot.slane %v2801_v49, %v3144_v18 }
 0x9e0   : > { %v1399_v51 = vmul.f32 %v1398_v50, %v1384_v36 }
 0x9e2   : > { %v1400_v52 = vsel %vm604_vm3, %v1399_v51, 0.0 }
 0x9e3   : > { %1401 = vadd.xlane.f32.xlu0 %v1400_v52 }
 0xa6c   : > { %v1402_v53 = vpop.xlane.xlu0 %1401 }
 0xa6d   : > { %v1403_v54 = vadd.f32 %v1402_v53, %v3169_v56 }
 0xa6f   : > { %2802 = vrcp.f32 %v1403_v54  ;;  %v1793_v54 = vld [vmem:[%s3353_s8 + $0xb8] sm:$0xff] }
 0xa7c   : > { %v2803_v55 = vpop.eup %2802 }
 0xa7d   : > { %1408 = vperm.xlu1 %2779, %v2803_v55  }
 0xaf8   : > { %v1409_v57 = vpop.permute.xlu1 %1408 }
 0xaf9   : > { %v1411_v58 = vmul.f32 %v1409_v57, %v1399_v51 }
 0xafb   : > { %v1412_v59 = vsel %vm604_vm3, %v1411_v58, 0.0 }
 0xafc   : > { %v1413_v60 = vrot.slane %v1412_v59, 4 }
 0xafe   : > { %v1414_v61 = vadd.f32 %v1413_v60, %v1412_v59 }
 0xb00   : > { %v1415_v62 = vrot.slane %v1414_v61, 2 }
 0xb02   : > { %v1416_v63 = vadd.f32 %v1415_v62, %v1414_v61 }
 0xb04   : > { %v1417_v1 = vrot.slane %v1416_v63, 1 }
 0xb06   : > { %v1418_v2 = vadd.f32 %v1417_v1, %v1416_v63 }
 0xb08   : > { %v1419_v3 = vadd.f32 %v1418_v2, %v3164_v48 }
 0xb0a   : > { %2804 = vrcp.f32 %v1419_v3 }
 0xb17   : > { %v2805_v4 = vpop.eup %2804 }
 0xb18   : > { %v1425_v5 = vrot.slane %v2805_v4, %v3144_v18 }
 0xb1a   : > { %v1426_v7 = vmul.f32 %v1425_v5, %v1411_v58 }
 0xb1c   : > { %v1427_v8 = vsel %vm604_vm3, %v1426_v7, 0.0 }
 0xb1d   : > { %1428 = vadd.xlane.f32.xlu0 %v1427_v8 }
 0xba6   : > { %v1429_v9 = vpop.xlane.xlu0 %1428 }
 0xba7   : > { %v1430_v11 = vadd.f32 %v1429_v9, %v3169_v56 }
 0xba9   : > { %2806 = vrcp.f32 %v1430_v11 }
 0xbb6   : > { %v2807_v13 = vpop.eup %2806 }
 0xbb7   : > { %1435 = vperm.xlu1 %2779, %v2807_v13  }
 0xc32   : > { %v1436_v14 = vpop.permute.xlu1 %1435 }
 0xc33   : > { %v1438_v15 = vmul.f32 %v1436_v14, %v1426_v7 }
 0xc35   : > { %1521 = vxpose.xlu0.b32.start.end [1/1] (short) (narrow) %v1438_v15, 8  ;;  %2669 = vmatmul.mubr.msk.f32.vlgmr.msra.gmra.mxu1 %vm604_vm3, %v1438_v15 }
 0xc36   : > { %2677 = vmatpush3.msra.mxu1 %v1446_v16 }
 0xc37   : > { %2678 = vmatprep.subr.mxu1 %v1445_v17 }
 0xc38   : > { %2679 = vmatpush3.msra.mxu1 %v1445_v17 }
 0xc39   : > { %2680 = vmatprep.subr.mxu1 %v1444_v19 }
 0xc3a   : > { %2681 = vmatpush3.msra.mxu1 %v1444_v19 }
 0xc3b   : > { %2682 = vmatprep.subr.mxu1 %v1443_v20 }
 0xc3c   : > { %2683 = vmatpush3.msra.mxu1 %v1443_v20 }
 0xc3d   : > { %2698 = vmatprep.subr.mxu1 %v1791_v29 }
 0xcb1   : > { %v1537_v21 = vpop.trf.xlu0 }
 0xcb2   : > { %2674 = vmatmul.mubr.msk.f32.vlgmr.msra.gmra.mxu0 %vm604_vm3, %v1537_v21 }
 0xcb3   : > { %2688 = vmatpush3.msra.mxu0 %v1442_v12  ;;  %2695 = vmatprep.mubr.msk.f32.mxu0 %vm652_vm2, %v3124_v6 }
 0xcb4   : > { %2689 = vmatprep.subr.mxu0 %v1441_v23 }
 0xcb5   : > { %2690 = vmatpush3.msra.mxu0 %v1441_v23 }
 0xcb6   : > { %2691 = vmatprep.subr.mxu0 %v1440_v24 }
 0xcb7   : > { %2692 = vmatpush3.msra.mxu0 %v1440_v24 }
 0xcb8   : > { %2693 = vmatprep.subr.mxu0 %v1439_v25 }
 0xcb9   : > { %2694 = vmatpush3.msra.mxu0 %v1439_v25 }
 0xcba   : > { %2696 = vmatmul.mubr.msk.f32.vlgmr.msra.gmra.mxu0 %vm652_vm2, %v3131_v10  ;;  %2709 = vmatprep.subr.mxu0 %v2894_v0  ;;  %v1790_v10 = vld [vmem:[%s3353_s8 + $0xa0] sm:$0xff] }
 0xcbb   : > { %2711 = vmatprep.mubr.msk.f32.mxu0 %vm2895_vm0, %v2894_v0 }
 0xcf5   : > { %v1517_v6 = vpop.f32.mrf.mxu1 }
 0xcf6   : > { %2684 = vmatprep.mubr.msk.f32.mxu1 %vm652_vm2, %v1517_v6 }
 0xcf7   : > { %v2670_v26 = vpop.f32.mrf.mxu1 }
 0xd72   : > { %v1622_v27 = vpop.f32.mrf.mxu0 }
 0xd73   : > { %2685 = vmatmul.mubr.msk.f32.vlgmr.msra.gmra.mxu1 %vm652_vm2, %v1622_v27 }
 0xd74   : > { %v2675_v28 = vpop.f32.mrf.mxu0  ;;  %2699 = vmatpush3.msra.mxu1 %v1791_v29 }
 0xd75   : > { %2700 = vmatprep.subr.mxu1 %v1790_v10 }
 0xd76   : > { %2701 = vmatpush3.msra.mxu1 %v1790_v10 }
 0xd77   : > { %2702 = vmatprep.subr.mxu1 %v1789_v30 }
 0xd78   : > { %2703 = vmatpush3.msra.mxu1 %v1789_v30 }
 0xd79   : > { %2704 = vmatprep.subr.mxu1 %v1788_v31 }
 0xd7a   : > { %2705 = vmatpush3.msra.mxu1 %v1788_v31  ;;  %v2697_v32 = vpop.f32.mrf.mxu0 }
 0xd7b   : > { %2719 = vmatprep.subr.mxu1 %v2894_v0 }
 0xd7c   : > { %v1773_v34 = vpop.f32.mrf.mxu0 }
 0xe33   : > { %v2686_v33 = vpop.f32.mrf.mxu1 }
 0xe34   : > { %v1779_v35 = vadd.f32 %v2697_v32, %v2686_v33 }
 0xe35   : > { %v1698_v36 = vpop.f32.mrf.mxu1 }
 0xe36   : > { %v1774_v39 = vadd.f32 %v1773_v34, %v1698_v36  ;;  %v1787_v41 = vadd.f32 %v2521_v37, %v1779_v35 }
 0xe38   : > { %v1786_v40 = vadd.f32 %v2521_v37, %v1774_v39 }
 0xe3a   : > { %2706 = vmatprep.mubr.msk.f32.mxu1 %vm652_vm2, %v1786_v40 }
 0xe3b   : > { %2707 = vmatmul.mubr.msk.f32.vlgmr.msra.gmra.mxu1 %vm652_vm2, %v1787_v41 }
 0xe3c   : > { %2727 = vmatprep.mubr.msk.f32.mxu1 %vm2895_vm0, %v2894_v0  ;;  %2720 = vmatpush3.msra.mxu1 %v1796_v43 }
 0xe3d   : > { %2721 = vmatprep.subr.mxu1 %v2894_v0 }
 0xe3e   : > { %2722 = vmatpush3.msra.mxu1 %v1795_v45 }
 0xe3f   : > { %2723 = vmatprep.subr.mxu1 %v2894_v0 }
 0xefb   : > { %v2708_v46 = vpop.f32.mrf.mxu1 }
 0xefc   : > { %v1879_v50 = vadd.f32 %v2708_v46, %v2522_v47 }
 0xefd   : > { %v1873_v49 = vpop.f32.mrf.mxu1 }
 0xefe   : > { %v1874_v51 = vadd.f32 %v2522_v47, %v1873_v49  ;;  %v1883_v53 = vmax.f32 %v1879_v50, 0.0 }
 0xf00   : > { %v1882_v52 = vmax.f32 %v1874_v51, 0.0 }
 0xf02   : > { %1885 = vrot.lane.b32.xlu1 %v1882_v52, %s2896_s25  ;;  %2710 = vmatpush3.msra.mxu0 %v1882_v52 }
 0xf03   : > { %2712 = vmatmul.mubr.msk.f32.vlgmr.msra.gmra.mxu0 %vm604_vm3, %v3066_v42  ;;  %2714 = vmatprep.subr.mxu0 %v2894_v0  ;;  %v1794_v42 = vld [vmem:[%s3353_s8 + $0xc0] sm:$0xff] }
 0xf04   : > { %2715 = vmatpush3.msra.mxu0 %v1883_v53  ;;  %2716 = vmatprep.mubr.msk.f32.mxu0 %vm2895_vm0, %v2894_v0 }
 0xf05   : > { %2730 = vmatprep.subr.mxu0 %v2894_v0  ;;  %2724 = vmatpush3.msra.mxu1 %v1794_v42 }
 0xf06   : > { %1959 = vrot.lane.b32.xlu1 %v1883_v53, %s2896_s25  ;;  %2725 = vmatprep.subr.mxu1 %v2894_v0  ;;  %s410_s25 = sand.u32 1, %s2884_s10  }
 0xf07   : > { %2717 = vmatmul.mubr.msk.f32.vlgmr.msra.gmra.mxu0 %vm604_vm3, %v3072_v44  ;;  %2726 = vmatpush3.msra.mxu1 %v1793_v54  ;;  %s2490_s26 = sshll.u32 %s410_s25, 3  ;;  %s2333_s28 = scalar_lea.sflag [#allocation3], %s410_s25 }
 0xf08   : > { %2732 = vmatprep.mubr.msk.f32.mxu0 %vm2895_vm0, %v2894_v0  ;;  %s412_s11 = scalar_lea.vmem [#allocation2], %s2490_s26 }
 0xf09   : > { %s2346_s15 = sshll.u32 %s412_s11, 4  ;;  %s2347_s15 = int_to_ptr.vmem [resolvable:$true] %s2346_s15 }
 0xf0a   : > { %s2832_s29 = scalar_lea.vmem %s2347_s15, 128  ;;  %p2839_p0 = scmp.lt.s32.totalorder %s2347_s15, %s2837_s14 }
 0xf0b   : > { %p2833_p11 = scmp.ne.s32.totalorder %s2347_s15, %s2832_s29  ;;  %p2840_p1 = scmp.lt.s32.totalorder %s2838_s13, %s2832_s29 }
 0xf0d   : > { %p2834_p12 = pnand %p2833_p11, %p2987_p5  ;;  %p2841_p2 = por %p2840_p1, %p2839_p0 }
 0xf0f   : > { %p2835_p13 = pneg %p2834_p12 }
 0xf11   : > { %p2842_p3 = pnand %p2841_p2, %p2835_p13 }
 0xf74   : > { %v1886_v55 = vpop.permute.xlu1 %1885 }
 0xf78   : > { %v1960_v44 = vpop.permute.xlu1 %1959 }
 0xfc3   : > { %v1954_v57 = vpop.f32.mrf.mxu0 }
 0xfc4   : > { %v1955_v58 = vadd.f32 %v1954_v57, %v1886_v55 }
 0xfc5   : > { %v2713_v59 = vpop.f32.mrf.mxu0 }
 0xfc6   : > { %2728 = vmatmul.mubr.msk.f32.vlgmr.msra.gmra.mxu1 %vm652_vm2, %v1955_v58 }
 0xfc7   : > { %v2028_v60 = vpop.f32.mrf.mxu0 }
 0xfc8   : > { %v2029_v61 = vadd.f32 %v2028_v60, %v1960_v44 }
 0xfc9   : > { %v2718_v62 = vpop.f32.mrf.mxu0 }
 0xfca   : > { %2731 = vmatpush3.xpose.msk.msra.mxu0 %vm652_vm2, %v2029_v61 }
0x1086   : > { %v2101_v63 = vpop.f32.mrf.mxu1 }
0x1087   : > { %2733 = vmatmul.mubr.msk.f32.vlgmr.msra.gmra.mxu0 %vm652_vm2, %v2101_v63 }
0x1088   : > { %v2729_v0 = vpop.f32.mrf.mxu1 }
0x1147   : > { %v2177_v1 = vpop.f32.mrf.mxu0 }
0x1148   : > { %v2181_v2 = vmul.f32 200.0, %v2177_v1 }
0x1149   : > { %v2734_v3 = vpop.f32.mrf.mxu0 }
0x114a   : > { %v2182_v4 = vsel %vm3147_vm5, %v2181_v2, -1e+30 }
0x114b   : > { %v2183_v5 = vsel %vm604_vm3, %v2182_v4, -inf }
0x114c   : > { %2184 = vmax.xlane.f32.xlu1 %v2183_v5 }
0x11d5   : > { %v2185_v7 = vpop.xlane.xlu1 %2184 }
0x11d6   : > { %v2186_v8 = vsub.f32 %v2182_v4, %v2185_v7 }
0x11d8   : > { %v2187_v9 = vmul.f32 1.442695, %v2186_v8 }
0x11da   : > { %2808 = vpow2.f32 %v2187_v9 }
0x11e7   : > { %v2809_v11 = vpop.eup %2808 }
0x11e8   : > { %v2189_v12 = vsel %vm604_vm3, %v2809_v11, 0.0 }
0x11e9   : > { %2190 = vadd.xlane.f32.xlu1 %v2189_v12 }
0x1272   : > { %v2191_v13 = vpop.xlane.xlu1 %2190 }
0x1273   : > { %2810 = vrcp.f32 %v2191_v13 }
0x1280   : > { %v2811_v14 = vpop.eup %2810 }
0x1281   : > { %v2193_v15 = vmul.f32 %v2811_v14, %v2809_v11 }
0x1283   : > { %v2194_v16 = vadd.f32 0.0001, %v2193_v15 }
0x1285   : > { %v2195_v17 = vmul.f32 %v2194_v16, %v3160_v38 }
0x1287   : > { %v2196_v22 = vsel %vm604_vm3, %v2195_v17, 0.0 }
0x1288   : > { %v2197_v19 = vrot.slane %v2196_v22, 4 }
0x128a   : > { %v2198_v20 = vadd.f32 %v2197_v19, %v2196_v22 }
0x128c   : > { %v2199_v21 = vrot.slane %v2198_v20, 2 }
0x128e   : > { %v2200_v23 = vadd.f32 %v2199_v21, %v2198_v20 }
0x1290   : > { %v2201_v24 = vrot.slane %v2200_v23, 1 }
0x1292   : > { %v2202_v25 = vadd.f32 %v2201_v24, %v2200_v23 }
0x1294   : > { %v2203_v6 = vadd.f32 %v2202_v25, %v3164_v48 }
0x1296   : > { %2812 = vrcp.f32 %v2203_v6 }
0x12a3   : > { %v2813_v26 = vpop.eup %2812 }
0x12a4   : > { %v2209_v27 = vrot.slane %v2813_v26, %v3144_v18 }
0x12a6   : > { %v2210_v28 = vmul.f32 %v2209_v27, %v2195_v17 }
0x12a8   : > { %v2211_v29 = vsel %vm604_vm3, %v2210_v28, 0.0 }
0x12a9   : > { %2212 = vadd.xlane.f32.xlu0 %v2211_v29 }
0x1332   : > { %v2213_v10 = vpop.xlane.xlu0 %2212 }
0x1333   : > { %v2214_v38 = vadd.f32 %v2213_v10, %v3169_v56 }
0x1335   : > { %2814 = vrcp.f32 %v2214_v38 }
0x1342   : > { %v2815_v30 = vpop.eup %2814 }
0x1343   : > { %2219 = vperm.xlu1 %2779, %v2815_v30  }
0x13be   : > { %v2220_v31 = vpop.permute.xlu1 %2219 }
0x13bf   : > { %v2222_v32 = vmul.f32 %v2220_v31, %v2210_v28 }
0x13c1   : > { %v2223_v33 = vsel %vm604_vm3, %v2222_v32, 0.0 }
0x13c2   : > { %v2224_v34 = vrot.slane %v2223_v33, 4 }
0x13c4   : > { %v2225_v35 = vadd.f32 %v2224_v34, %v2223_v33 }
0x13c6   : > { %v2226_v36 = vrot.slane %v2225_v35, 2 }
0x13c8   : > { %v2227_v37 = vadd.f32 %v2226_v36, %v2225_v35 }
0x13ca   : > { %v2228_v39 = vrot.slane %v2227_v37, 1 }
0x13cc   : > { %v2229_v40 = vadd.f32 %v2228_v39, %v2227_v37 }
0x13ce   : > { %v2230_v41 = vadd.f32 %v2229_v40, %v3164_v48 }
0x13d0   : > { %2816 = vrcp.f32 %v2230_v41 }
0x13dd   : > { %v2817_v43 = vpop.eup %2816 }
0x13de   : > { %v2236_v45 = vrot.slane %v2817_v43, %v3144_v18 }
0x13e0   : > { %v2237_v46 = vmul.f32 %v2236_v45, %v2222_v32 }
0x13e2   : > { %v2238_v47 = vsel %vm604_vm3, %v2237_v46, 0.0 }
0x13e3   : > { %2239 = vadd.xlane.f32.xlu1 %v2238_v47 }
0x146c   : > { %v2240_v49 = vpop.xlane.xlu1 %2239 }
0x146d   : > { %v2241_v50 = vadd.f32 %v2240_v49, %v3169_v56 }
0x146f   : > { %2818 = vrcp.f32 %v2241_v50 }
0x147c   : > { %v2819_v51 = vpop.eup %2818 }
0x147d   : > { %2246 = vperm.xlu0 %2778, %v2819_v51  }
0x14f8   : > { %v2247_v52 = vpop.permute.xlu0 %2246 }
0x14f9   : > { %v2249_v53 = vmul.f32 %v2247_v52, %v2237_v46 }
0x14fb   : > { %v2250_v42 = vsel %vm604_vm3, %v2249_v53, 0.0 }
0x14fc   : > { %v2251_v54 = vrot.slane %v2250_v42, 4 }
0x14fe   : > { %v2252_v55 = vadd.f32 %v2251_v54, %v2250_v42 }
0x1500   : > { %v2253_v57 = vrot.slane %v2252_v55, 2 }
0x1502   : > { %v2254_v58 = vadd.f32 %v2253_v57, %v2252_v55 }
0x1504   : > { %v2255_v59 = vrot.slane %v2254_v58, 1 }
0x1506   : > { %v2256_v44 = vadd.f32 %v2255_v59, %v2254_v58 }
0x1508   : > { %v2257_v60 = vadd.f32 %v2256_v44, %v3164_v48 }
0x150a   : > { %2820 = vrcp.f32 %v2257_v60 }
0x1517   : > { %v2821_v61 = vpop.eup %2820 }
0x1518   : > { %v2263_v62 = vrot.slane %v2821_v61, %v3144_v18 }
0x151a   : > { %v2264_v63 = vmul.f32 %v2263_v62, %v2249_v53 }
0x151c   : > { %v2265_v0 = vsel %vm604_vm3, %v2264_v63, 0.0 }
0x151d   : > { %2266 = vadd.xlane.f32.xlu1 %v2265_v0 }
0x15a6   : > { %v2267_v1 = vpop.xlane.xlu1 %2266 }
0x15a7   : > { %v2268_v2 = vadd.f32 %v2267_v1, %v3169_v56 }
0x15a9   : > { %2822 = vrcp.f32 %v2268_v2 }
0x15b6   : > { %v2823_v3 = vpop.eup %2822 }
0x15b7   : > { %2273 = vperm.xlu1 %2779, %v2823_v3  }
0x1632   : > { %v2274_v4 = vpop.permute.xlu1 %2273 }
0x1633   : > { %v2276_v5 = vmul.f32 %v2274_v4, %v2264_v63 }
0x1635   : > { %v2277_v7 = vsel %vm604_vm3, %v2276_v5, 0.0 }
0x1636   : > { %v2278_v8 = vrot.slane %v2277_v7, 4 }
0x1638   : > { %v2279_v9 = vadd.f32 %v2278_v8, %v2277_v7 }
0x163a   : > { %v2280_v11 = vrot.slane %v2279_v9, 2 }
0x163c   : > { %v2281_v12 = vadd.f32 %v2280_v11, %v2279_v9 }
0x163e   : > { %v2282_v13 = vrot.slane %v2281_v12, 1 }
0x1640   : > { %v2283_v14 = vadd.f32 %v2282_v13, %v2281_v12 }
0x1642   : > { %v2284_v15 = vadd.f32 %v2283_v14, %v3164_v48 }
0x1644   : > { %2824 = vrcp.f32 %v2284_v15 }
0x1651   : > { %v2825_v16 = vpop.eup %2824 }
0x1652   : > { %v2290_v17 = vrot.slane %v2825_v16, %v3144_v18 }
0x1654   : > { %v2291_v22 = vmul.f32 %v2290_v17, %v2276_v5 }
0x1656   : > { %v2292_v19 = vsel %vm604_vm3, %v2291_v22, 0.0 }
0x1657   : > { %2293 = vadd.xlane.f32.xlu0 %v2292_v19 }
0x16e0   : > { %v2294_v20 = vpop.xlane.xlu0 %2293 }
0x16e1   : > { %v2295_v21 = vadd.f32 %v2294_v20, %v3169_v56 }
0x16e3   : > { %2826 = vrcp.f32 %v2295_v21 }
0x16f0   : > { %v2827_v23 = vpop.eup %2826 }
0x16f1   : > { %2300 = vperm.xlu1 %2779, %v2827_v23  }
0x176c   : > { %v2301_v24 = vpop.permute.xlu1 %2300 }
0x176d   : > { %v2303_v25 = vmul.f32 %v2301_v24, %v2291_v22 }
0x176f   : > { %v2304_v6 = vsel %vm604_vm3, %v2303_v25, 0.0 }
0x1770   : > { %v2305_v26 = vrot.slane %v2304_v6, 4 }
0x1772   : > { %v2306_v27 = vadd.f32 %v2305_v26, %v2304_v6 }
0x1774   : > { %v2307_v28 = vrot.slane %v2306_v27, 2 }
0x1776   : > { %v2308_v29 = vadd.f32 %v2307_v28, %v2306_v27 }
0x1778   : > { %v2309_v10 = vrot.slane %v2308_v29, 1 }
0x177a   : > { %v2310_v38 = vadd.f32 %v2309_v10, %v2308_v29 }
0x177c   : > { %v2311_v30 = vadd.f32 %v2310_v38, %v3164_v48 }
0x177e   : > { %2828 = vrcp.f32 %v2311_v30 }
0x178b   : > { %v2829_v31 = vpop.eup %2828 }
0x178c   : > { %v2317_v32 = vrot.slane %v2829_v31, %v3144_v18 }
0x178e   : > { %v2318_v33 = vmul.f32 %v2317_v32, %v2303_v25 }
0x1790   : > { %v2319_v34 = vsel %vm604_vm3, %v2318_v33, 0.0 }
0x1791   : > { %2320 = vadd.xlane.f32.xlu1 %v2319_v34 }
0x181a   : > { %v2321_v35 = vpop.xlane.xlu1 %2320 }
0x181b   : > { %v2322_v36 = vadd.f32 %v2321_v35, %v3169_v56 }
0x181d   : > { %2830 = vrcp.f32 %v2322_v36 }
0x182a   : > { %v2831_v37 = vpop.eup %2830 }
0x182b   : > { %2327 = vperm.xlu0 %2778, %v2831_v37  }
0x18a6   : > { %v2328_v48 = vpop.permute.xlu0 %2327 }
0x18a7   : > { %v2330_v39 = vmul.f32 %v2328_v48, %v2318_v33 }
0x18a9   : > { %2331 = vst.msk [vmem:[%s412_s11] sm:$0xff] %vm604_vm3, %v2330_v39 }
0x18aa   : > { %2845 = shalt.err (!%p2842_p3)
}
0x18ab   : > { %s2846_s16 = scalar_lea.hbm %s2344_s21, 128  ;;  %s2850_s24 = scalar_lea.hbm %s3354_s9, 256 }
0x18ac   : > { %p2847_p4 = scmp.ne.s32.totalorder %s2344_s21, %s2846_s16  ;;  %p2851_p9 = scmp.lt.s32.totalorder %s2344_s21, %s3354_s9 }
0x18ad   : > { %p2852_p10 = scmp.lt.s32.totalorder %s2850_s24, %s2846_s16 }
0x18ae   : > { %p2848_p7 = pnand %p2847_p4, %p2987_p5 }
0x18af   : > { %p2853_p11 = por %p2852_p10, %p2851_p9 }
0x18b0   : > { %p2849_p8 = pneg %p2848_p7 }
0x18b2   : > { %p2854_p12 = pnand %p2853_p11, %p2849_p8 }
0x18b4   : > { %2857 = shalt.err (!%p2854_p12)
}
0x18b5   : > { %2735 = dma.vmem_to_hbm [thread:$0]  (%p2987_p5), %s2347_s15, 128, %s2344_s21, %s2333_s28  }
0x18b6 PF: > { %p2741_p13 = scmp.ge.s32.totalorder %s2892_s12, 2  ;;  %s2358_s11 = sand.u32 1, %s2880_s30  }
0x18b7   : > { %s2359_s18 = scalar_lea.sflag [#allocation3], %s2358_s11 }
0x18b8   : > { %p2738_p0 = pnand %p2741_p13, %p2991_p6 }
0x18ba   : > { %p2739_p1 = pneg %p2738_p0 }
0x18bc   : > { %2875 = dma.done.wait (%p2739_p1), %s2359_s18, 128  }
0x18bd   : > { %2877 = vsyncadd (%p2739_p1), %s2359_s18, 4294967168  ;;  %s3368_s12 = sld [smem:[#allocation6_spill]]  ;;  %s3371_s30 = smov %s2884_s10 }
0x18be   : > { %s3369_s20 = sld [smem:[#allocation5_spill]] }
0x18bf   : > { %s3370_s11 = sld [smem:[#allocation7_spill]] }
0x18c3   : > { %p19_p2 = scmp.ge.s32.totalorder %s3368_s12, 4  }
0x18c4   : > { %s3372_s10 = smov %s3369_s20 }
0x18c5   :  { %21 = sbr.rel (!%p19_p2) target bundleno = 3 (0x3), region = 112 }
0x18ca   :  { %2364 = vsyncpa [#allocation3], 1 }
0x18cb   :  { %2366 = vsyncpa [#allocation3 + $0x1], 1 }

</bundles_post_ra>
